<compile_context>
chip_gen: v7x
topology: tpu7x:2x2x1
jax: 0.10.0
libtpu: 0.0.40
codegen_flags: <defaults>
</compile_context>

<pallas_src>
import jax
import jax.numpy as jnp
import numpy as np
from jax.experimental import pallas as pl
from jax.experimental.pallas import tpu as pltpu

HID = 32          # NNConv out_channels / hidden width (matches the PyTorch module)
OUT_PAD = 128     # lane-dense padding of the final fc2 output


def _net_mp_kernel(
    src_ref, tgt_ref, ea_ref, x_ref,
    wcat_ref, root_ref, bias_ref,          # per-layer (selected by grid axis 0)
    wf1_ref, bf1_ref, wf2_ref, bf2_ref,    # fc1 / fc2 (fc2 padded to 128 lanes)
    out_ref,
    h_s, p_s, acc_s, lane_s, row_s,
):
    l = pl.program_id(0)          # layer index (0..2), sequential
    e = pl.program_id(1)          # edge-tile index, sequential reduction
    n_et = pl.num_programs(1)
    n_nodes = h_s.shape[0]
    te = src_ref.shape[0]
    cout = acc_s.shape[1]

    # ---- one-time init: (zero-padded) node features + grid-invariant iotas ----
    @pl.when((l == 0) & (e == 0))
    def _():
        h_s[...] = x_ref[...]
        lane_s[...] = jax.lax.broadcasted_iota(jnp.int32, (te, n_nodes), 1)
        row_s[...] = jax.lax.broadcasted_iota(jnp.int32, (n_nodes, te), 0)

    # ---- per-layer init (first edge tile): root/bias term + pre-folded P ----
    #   acc = h @ root + bias
    #   P   = h @ [Bm | Wa | Wb]   -> [N, 3*cout], ONE bf16 MXU op per layer,
    #                                 stored in bf16 scratch (no per-tile casts)
    @pl.when(e == 0)
    def _():
        h_bf = h_s[...].astype(jnp.bfloat16)
        acc_s[...] = (jnp.dot(h_bf, root_ref[...],
                              preferred_element_type=jnp.float32) + bias_ref[...])
        p_s[...] = jnp.dot(h_bf, wcat_ref[...],
                           preferred_element_type=jnp.float32).astype(jnp.bfloat16)

    # ---- per edge tile: gather P -> message (VPU) -> scatter-add ----
    src = src_ref[...]                       # [TE, 1] int32 (padded edges: src = N)
    tgt = tgt_ref[...]                       # [1, TE] int32 (padded edges: tgt = N)
    ea = ea_ref[...]                         # [TE, 2]  f32

    # selector = direct compare -> bf16 (exact 0/1), f32 MXU accumulation
    gth = (src == lane_s[...]).astype(jnp.bfloat16)                       # [TE, N]
    pt = jnp.dot(gth, p_s[...], preferred_element_type=jnp.float32)       # [TE, 3C]
    # NOTE: the three 32-lane slices below live in one 128-lane group; pad wcat
    # to [32, 3*128] only if a bundle dump shows XLU co-binding.
    m = (pt[:, :cout]
         + ea[:, 0:1] * pt[:, cout:2 * cout]
         + ea[:, 1:2] * pt[:, 2 * cout:3 * cout])                         # [TE, C]

    sct = (row_s[...] == tgt).astype(jnp.bfloat16)                        # [N, TE]
    acc_s[...] += jnp.dot(sct, m.astype(jnp.bfloat16),
                          preferred_element_type=jnp.float32)             # scatter-add

    # ---- end-of-layer finalize ----
    last_e = e == n_et - 1

    @pl.when(last_e & (l < 2))
    def _():
        h_s[...] = jnp.maximum(acc_s[...], 0.0)     # relu(conv_l) feeds next layer

    @pl.when(last_e & (l == 2))
    def _():
        h = jnp.maximum(acc_s[...], 0.0).astype(jnp.bfloat16)
        z = jnp.maximum(jnp.dot(h, wf1_ref[...],
                                preferred_element_type=jnp.float32) + bf1_ref[...],
                        0.0)
        out_ref[...] = (jnp.dot(z.astype(jnp.bfloat16), wf2_ref[...],
                                preferred_element_type=jnp.float32) + bf2_ref[...])


def _padded_block_bytes(shape, itemsize):
    """Conservative VMEM footprint of one buffer: round last dim to 128 lanes
    and second-to-last to 16 sublanes (covers f32 and packed bf16/int layouts)."""
    s = tuple(int(d) for d in shape if d is not None)
    if len(s) == 1:
        s = (1,) + s
    lead = 1
    for d in s[:-2]:
        lead *= d
    rows = -(-s[-2] // 16) * 16
    cols = -(-s[-1] // 128) * 128
    return lead * rows * cols * itemsize


def net_mp_forward(x, edge_index, edge_attr, params, *, edge_tile=256):
    """x:[N,2] f32, edge_index:[2,E] int32 (row0=src, row1=tgt), edge_attr:[E,2] f32.

    edge_tile: 256 targets v6e/v7x (2x256^2 MXU, fewer ~600-cycle grid steps);
    128 already fills v5e's 4x128^2 MXU — sweep per generation.
    """
    N = x.shape[0]
    E = edge_attr.shape[0]
    p = list(params)
    bf16 = jnp.bfloat16

    # ---- wrapper-side weight preprocessing (one-time glue, not per-edge work) ----
    wcat_l, root_l, bias_l = [], [], []
    for li in range(3):
        wa, wb, bm, root, bias = p[5 * li:5 * li + 5]
        cin = wa.shape[0]
        pad_cin = lambda w: jnp.pad(w, ((0, HID - cin), (0, 0)))
        wcat_l.append(jnp.concatenate([pad_cin(bm), pad_cin(wa), pad_cin(wb)], axis=1))
        root_l.append(pad_cin(root))
        bias_l.append(bias)
    # weights pre-cast to bf16 (MXU-native single pass); biases stay f32
    wcat_s = jnp.stack(wcat_l).astype(bf16)                       # [3, 32, 96]
    root_s = jnp.stack(root_l).astype(bf16)                       # [3, 32, 32]
    bias_s = jnp.stack(bias_l)                                    # [3, 1, 32] f32
    wf1, bf1, wf2, bf2 = p[15:19]
    wf1b = wf1.astype(bf16)                                       # [32, 32]
    wf2p = jnp.pad(wf2, ((0, 0), (0, OUT_PAD - wf2.shape[1]))).astype(bf16)  # [32,128]
    bf2p = jnp.pad(bf2, ((0, 0), (0, OUT_PAD - bf2.shape[1])))    # [1, 128] f32

    # conv1 input zero-padded to cin = HID so all layers share one weight shape
    x_pad = jnp.pad(x, ((0, 0), (0, HID - x.shape[1])))           # [N, 32]

    # ---- edge data: pad E up to a multiple of the edge tile; pad idx = N (no-op) ----
    TE = edge_tile
    E_pad = ((E + TE - 1) // TE) * TE
    n_et = E_pad // TE
    pad = E_pad - E
    src = jnp.pad(edge_index[0].astype(jnp.int32), (0, pad), constant_values=N)
    tgt = jnp.pad(edge_index[1].astype(jnp.int32), (0, pad), constant_values=N)
    src_col = src.reshape(E_pad, 1)
    tgt_row = tgt.reshape(1, E_pad)
    ea_pad = jnp.pad(edge_attr, ((0, pad), (0, 0)))

    grid = (3, n_et)
    in_specs = [
        pl.BlockSpec((TE, 1), lambda l, e: (e, 0)),                  # src (col layout)
        pl.BlockSpec((1, TE), lambda l, e: (0, e)),                  # tgt (row layout)
        pl.BlockSpec((TE, 2), lambda l, e: (e, 0)),                  # edge_attr tile
        pl.BlockSpec((N, HID), lambda l, e: (0, 0)),                 # x (resident)
        pl.BlockSpec((None, HID, 3 * HID), lambda l, e: (l, 0, 0)),  # [Bm|Wa|Wb] / layer
        pl.BlockSpec((None, HID, HID), lambda l, e: (l, 0, 0)),      # root per layer
        pl.BlockSpec((None, 1, HID), lambda l, e: (l, 0, 0)),        # bias per layer
        pl.BlockSpec((HID, HID), lambda l, e: (0, 0)),               # fc1 w (bf16)
        pl.BlockSpec((1, HID), lambda l, e: (0, 0)),                 # fc1 b
        pl.BlockSpec((HID, OUT_PAD), lambda l, e: (0, 0)),           # fc2 w (bf16, padded)
        pl.BlockSpec((1, OUT_PAD), lambda l, e: (0, 0)),             # fc2 b (padded)
    ]
    out_specs = pl.BlockSpec((N, OUT_PAD), lambda l, e: (0, 0))

    scratch_shapes = [
        pltpu.VMEM((N, HID), jnp.float32),       # h   (current node features)
        pltpu.VMEM((N, 3 * HID), jnp.bfloat16),  # P   (pre-folded projection, bf16)
        pltpu.VMEM((N, HID), jnp.float32),       # acc (scatter accumulator)
        pltpu.VMEM((TE, N), jnp.int32),          # node-id iota for gather selector
        pltpu.VMEM((N, TE), jnp.int32),          # node-id iota for scatter selector
    ]

    # ---- VMEM budget sized to actual usage (review: no flat 48 MiB; v7x = 64 MiB) ----
    # Inputs/output are double-buffered by the auto-pipeline; scratch is single.
    # TODO(synk): pipeline_mode=pl.Buffered(1) on the constant-index blocks would
    #             drop their redundant second buffer for very large graphs.
    blk_bytes = [
        ((TE, 1), 4), ((1, TE), 4), ((TE, 2), 4), ((N, HID), 4),
        ((HID, 3 * HID), 2), ((HID, HID), 2), ((1, HID), 4),
        ((HID, HID), 2), ((1, HID), 4), ((HID, OUT_PAD), 2), ((1, OUT_PAD), 4),
        ((N, OUT_PAD), 4),                                          # output block
    ]
    scr_bytes = [((N, HID), 4), ((N, 3 * HID), 2), ((N, HID), 4),
                 ((TE, N), 4), ((N, TE), 4)]
    est = (sum(2 * _padded_block_bytes(s, b) for s, b in blk_bytes)
           + sum(_padded_block_bytes(s, b) for s, b in scr_bytes))
    vmem_limit = int(min(112 << 20, max(16 << 20, 2 * est + (8 << 20))))

    out_full = pl.pallas_call(
        _net_mp_kernel,
        out_shape=jax.ShapeDtypeStruct((N, OUT_PAD), jnp.float32),
        grid_spec=pltpu.PrefetchScalarGridSpec(
            num_scalar_prefetch=0,
            grid=grid,
            in_specs=in_specs,
            out_specs=out_specs,
            scratch_shapes=scratch_shapes,
        ),
        compiler_params=pltpu.CompilerParams(
            # both axes are sequential reductions (layer chaining / scatter-add);
            # TODO(synk): add a "parallel" node-partition axis for v7x's 2 TCs.
            dimension_semantics=("arbitrary", "arbitrary"),
            vmem_limit_bytes=vmem_limit,
        ),
    )(src_col, tgt_row, ea_pad, x_pad,
      wcat_s, root_s, bias_s, wf1b, bf1, wf2p, bf2p)

    return out_full[:, :1]


def init_params(key):
    """Deterministic synthetic parameters matching Net_MP shapes (already split/reshaped)."""
    ks = iter(jax.random.split(key, 32))

    def lin_w(fan_in, fan_out, scale):
        return scale * jax.random.normal(next(ks), (fan_in, fan_out), jnp.float32)

    def lin_b(fan_out):
        return 0.01 * jax.random.normal(next(ks), (1, fan_out), jnp.float32)

    params = []
    for cin, cout in [(2, HID), (HID, HID), (HID, HID)]:
        # edge NN: Linear(2, cin*cout) -> wn:[2, cin*cout], bn:[cin*cout]
        wn = lin_w(2, cin * cout, 0.5 / np.sqrt(2 * cin))
        bn = 0.01 * jax.random.normal(next(ks), (cin * cout,), jnp.float32)
        wa = wn[0].reshape(cin, cout)       # contribution of edge_attr[:, 0]
        wb = wn[1].reshape(cin, cout)       # contribution of edge_attr[:, 1]
        bm = bn.reshape(cin, cout)          # edge-NN bias folded into W_e
        root = lin_w(cin, cout, 1.0 / np.sqrt(cin))
        bias = lin_b(cout)
        params += [wa, wb, bm, root, bias]
    params += [lin_w(HID, HID, 1.0 / np.sqrt(HID)), lin_b(HID)]   # fc1
    params += [lin_w(HID, 1, 1.0 / np.sqrt(HID)), lin_b(1)]       # fc2
    return params


def reference_forward(x, edge_index, edge_attr, params):
    """Pure-JAX f32 reference (mirrors torch_geometric NNConv aggr='add')."""
    src, tgt = edge_index[0], edge_index[1]
    N = x.shape[0]
    hi = jax.lax.Precision.HIGHEST

    def nnconv(h, wa, wb, bm, root, bias):
        W = (edge_attr[:, 0:1, None] * wa[None]
             + edge_attr[:, 1:2, None] * wb[None] + bm[None])           # [E, cin, cout]
        m = jnp.einsum('ec,eco->eo', h[src], W, precision=hi)           # [E, cout]
        agg = jnp.zeros((N, W.shape[-1]), jnp.float32).at[tgt].add(m)   # scatter-add
        return agg + jnp.dot(h, root, precision=hi) + bias

    p = list(params)
    h = jax.nn.relu(nnconv(x, *p[0:5]))
    h = jax.nn.relu(nnconv(h, *p[5:10]))
    h = jax.nn.relu(nnconv(h, *p[10:15]))
    h = jax.nn.relu(jnp.dot(h, p[15], precision=hi) + p[16])
    return jnp.dot(h, p[17], precision=hi) + p[18]


if __name__ == "__main__":
    key = jax.random.PRNGKey(0)
    k_x, k_ea, k_ei, k_p = jax.random.split(key, 4)

    N, E = 16, 48
    x = jax.random.normal(k_x, (N, 2), jnp.float32)
    edge_attr = jax.random.normal(k_ea, (E, 2), jnp.float32)
    edge_index = jax.random.randint(k_ei, (2, E), 0, N, jnp.int32)
    params = init_params(k_p)

    out = net_mp_forward(x, edge_index, edge_attr, params)
    out = jax.block_until_ready(out)

    ref = reference_forward(x, edge_index, edge_attr, params)
    # Tolerance reflects the intentional bf16 relaxation of the whole kernel
    # (bf16 weights / P / selector matmuls, f32 MXU accumulation); structural
    # errors would be O(1).
    np.testing.assert_allclose(np.asarray(out), np.asarray(ref), rtol=5e-2, atol=5e-2)

    print("KERNEL_OK")
</pallas_src>

<mosaic_0001>
module attributes {stable_mosaic.version = 11 : i64} {
  func.func @_net_mp_kernel(%arg0: i32, %arg1: i32, %arg2: memref<256x1xi32, #tpu.memory_space<vmem>>, %arg3: memref<1x256xi32, #tpu.memory_space<vmem>>, %arg4: memref<256x2xf32, #tpu.memory_space<vmem>>, %arg5: memref<16x32xf32, #tpu.memory_space<vmem>>, %arg6: memref<1x32x96xbf16, #tpu.memory_space<vmem>>, %arg7: memref<1x32x32xbf16, #tpu.memory_space<vmem>>, %arg8: memref<1x1x32xf32, #tpu.memory_space<vmem>>, %arg9: memref<32x32xbf16, #tpu.memory_space<vmem>>, %arg10: memref<1x32xf32, #tpu.memory_space<vmem>>, %arg11: memref<32x128xbf16, #tpu.memory_space<vmem>>, %arg12: memref<1x128xf32, #tpu.memory_space<vmem>>, %arg13: memref<16x128xf32, #tpu.memory_space<vmem>>, %arg14: memref<16x32xf32, #tpu.memory_space<vmem>>, %arg15: memref<16x96xbf16, #tpu.memory_space<vmem>>, %arg16: memref<16x32xf32, #tpu.memory_space<vmem>>, %arg17: memref<256x16xi32, #tpu.memory_space<vmem>>, %arg18: memref<16x256xi32, #tpu.memory_space<vmem>>) attributes {dimension_semantics = [#tpu.dimension_semantics<arbitrary>, #tpu.dimension_semantics<arbitrary>], iteration_bounds = array<i64: 3, 1>, scalar_prefetch = 0 : i64, scratch_operands = 5 : i64, tpu.core_type = #tpu.core_type<tc>, window_params = [{transform_indices = @transform_0, window_bounds = array<i64: 256, 1>}, {transform_indices = @transform_1, window_bounds = array<i64: 1, 256>}, {transform_indices = @transform_2, window_bounds = array<i64: 256, 2>}, {pipeline_mode = #tpu.pipeline_mode<synchronous>, transform_indices = @transform_3, window_bounds = array<i64: 16, 32>}, {transform_indices = @transform_4, window_bounds = array<i64: 1, 32, 96>}, {transform_indices = @transform_5, window_bounds = array<i64: 1, 32, 32>}, {transform_indices = @transform_6, window_bounds = array<i64: 1, 1, 32>}, {pipeline_mode = #tpu.pipeline_mode<synchronous>, transform_indices = @transform_7, window_bounds = array<i64: 32, 32>}, {pipeline_mode = #tpu.pipeline_mode<synchronous>, transform_indices = @transform_8, window_bounds = array<i64: 1, 32>}, {pipeline_mode = #tpu.pipeline_mode<synchronous>, transform_indices = @transform_9, window_bounds = array<i64: 32, 128>}, {pipeline_mode = #tpu.pipeline_mode<synchronous>, transform_indices = @transform_10, window_bounds = array<i64: 1, 128>}, {pipeline_mode = #tpu.pipeline_mode<synchronous>, transform_indices = @transform_11, window_bounds = array<i64: 16, 128>}]} {
    %c0_i32 = arith.constant 0 : i32
    %0 = arith.cmpi eq, %arg0, %c0_i32 : i32
    %c0_i32_0 = arith.constant 0 : i32
    %1 = arith.cmpi eq, %arg1, %c0_i32_0 : i32
    %2 = arith.andi %0, %1 : i1
    %3 = arith.extui %2 : i1 to i32
    %c0_i32_1 = arith.constant 0 : i32
    %4 = arith.cmpi ne, %3, %c0_i32_1 : i32
    scf.if %4 {
      %c0_24 = arith.constant 0 : index
      %c0_25 = arith.constant 0 : index
      %50 = vector.load %arg5[%c0_24, %c0_25] : memref<16x32xf32, #tpu.memory_space<vmem>>, vector<16x32xf32>
      %c0_26 = arith.constant 0 : index
      %c0_27 = arith.constant 0 : index
      %51 = vector.load %arg14[%c0_26, %c0_27] : memref<16x32xf32, #tpu.memory_space<vmem>>, vector<16x32xf32>
      tpu.vector_store %arg14[%c0_26, %c0_27], %50 {strides = array<i32>} : memref<16x32xf32, #tpu.memory_space<vmem>>, vector<16x32xf32>,
      %52 = tpu.iota {dimensions = array<i32: 1>} : vector<256x16xi32>
      %c0_28 = arith.constant 0 : index
      %c0_29 = arith.constant 0 : index
      %53 = vector.load %arg17[%c0_28, %c0_29] : memref<256x16xi32, #tpu.memory_space<vmem>>, vector<256x16xi32>
      tpu.vector_store %arg17[%c0_28, %c0_29], %52 {strides = array<i32>} : memref<256x16xi32, #tpu.memory_space<vmem>>, vector<256x16xi32>,
      %54 = tpu.iota {dimensions = array<i32: 0>} : vector<16x256xi32>
      %c0_30 = arith.constant 0 : index
      %c0_31 = arith.constant 0 : index
      %55 = vector.load %arg18[%c0_30, %c0_31] : memref<16x256xi32, #tpu.memory_space<vmem>>, vector<16x256xi32>
      tpu.vector_store %arg18[%c0_30, %c0_31], %54 {strides = array<i32>} : memref<16x256xi32, #tpu.memory_space<vmem>>, vector<16x256xi32>,
    } else {
    }
    %c0_i32_2 = arith.constant 0 : i32
    %5 = arith.cmpi eq, %arg1, %c0_i32_2 : i32
    %6 = arith.extui %5 : i1 to i32
    %c0_i32_3 = arith.constant 0 : i32
    %7 = arith.cmpi ne, %6, %c0_i32_3 : i32
    scf.if %7 {
      %c0_24 = arith.constant 0 : index
      %c0_25 = arith.constant 0 : index
      %50 = vector.load %arg14[%c0_24, %c0_25] : memref<16x32xf32, #tpu.memory_space<vmem>>, vector<16x32xf32>
      %51 = arith.truncf %50 : vector<16x32xf32> to vector<16x32xbf16>
      %c0_26 = arith.constant 0 : index
      %c0_27 = arith.constant 0 : index
      %c0_28 = arith.constant 0 : index
      %52 = vector.load %arg7[%c0_26, %c0_27, %c0_28] : memref<1x32x32xbf16, #tpu.memory_space<vmem>>, vector<1x32x32xbf16>
      %53 = vector.shape_cast %52 : vector<1x32x32xbf16> to vector<32x32xbf16>
      %cst_29 = arith.constant dense<0.000000e+00> : vector<16x32xf32>
      %54 = tpu.matmul %51, %53, %cst_29 {dimension_numbers = #tpu.dot_dimension_numbers<[1], [0], [0], [1], [0, 0, 1, 1], [], []>} : vector<16x32xbf16>, vector<32x32xbf16>, vector<16x32xf32> -> vector<16x32xf32>
      %c0_30 = arith.constant 0 : index
      %c0_31 = arith.constant 0 : index
      %c0_32 = arith.constant 0 : index
      %55 = vector.load %arg8[%c0_30, %c0_31, %c0_32] : memref<1x1x32xf32, #tpu.memory_space<vmem>>, vector<1x1x32xf32>
      %56 = vector.shape_cast %55 : vector<1x1x32xf32> to vector<1x32xf32>
      %57 = vector.broadcast %56 : vector<1x32xf32> to vector<16x32xf32>
      %58 = arith.addf %54, %57 : vector<16x32xf32>
      %c0_33 = arith.constant 0 : index
      %c0_34 = arith.constant 0 : index
      %59 = vector.load %arg16[%c0_33, %c0_34] : memref<16x32xf32, #tpu.memory_space<vmem>>, vector<16x32xf32>
      tpu.vector_store %arg16[%c0_33, %c0_34], %58 {strides = array<i32>} : memref<16x32xf32, #tpu.memory_space<vmem>>, vector<16x32xf32>,
      %c0_35 = arith.constant 0 : index
      %c0_36 = arith.constant 0 : index
      %c0_37 = arith.constant 0 : index
      %60 = vector.load %arg6[%c0_35, %c0_36, %c0_37] : memref<1x32x96xbf16, #tpu.memory_space<vmem>>, vector<1x32x96xbf16>
      %61 = vector.shape_cast %60 : vector<1x32x96xbf16> to vector<32x96xbf16>
      %cst_38 = arith.constant dense<0.000000e+00> : vector<16x96xf32>
      %62 = tpu.matmul %51, %61, %cst_38 {dimension_numbers = #tpu.dot_dimension_numbers<[1], [0], [0], [1], [0, 0, 1, 1], [], []>} : vector<16x32xbf16>, vector<32x96xbf16>, vector<16x96xf32> -> vector<16x96xf32>
      %63 = arith.truncf %62 : vector<16x96xf32> to vector<16x96xbf16>
      %c0_39 = arith.constant 0 : index
      %c0_40 = arith.constant 0 : index
      %64 = vector.load %arg15[%c0_39, %c0_40] : memref<16x96xbf16, #tpu.memory_space<vmem>>, vector<16x96xbf16>
      tpu.vector_store %arg15[%c0_39, %c0_40], %63 {strides = array<i32>} : memref<16x96xbf16, #tpu.memory_space<vmem>>, vector<16x96xbf16>,
    } else {
    }
    %c0 = arith.constant 0 : index
    %c0_4 = arith.constant 0 : index
    %8 = vector.load %arg2[%c0, %c0_4] : memref<256x1xi32, #tpu.memory_space<vmem>>, vector<256x1xi32>
    %c0_5 = arith.constant 0 : index
    %c0_6 = arith.constant 0 : index
    %9 = vector.load %arg3[%c0_5, %c0_6] : memref<1x256xi32, #tpu.memory_space<vmem>>, vector<1x256xi32>
    %c0_7 = arith.constant 0 : index
    %c0_8 = arith.constant 0 : index
    %10 = vector.load %arg4[%c0_7, %c0_8] : memref<256x2xf32, #tpu.memory_space<vmem>>, vector<256x2xf32>
    %c0_9 = arith.constant 0 : index
    %c0_10 = arith.constant 0 : index
    %11 = vector.load %arg17[%c0_9, %c0_10] : memref<256x16xi32, #tpu.memory_space<vmem>>, vector<256x16xi32>
    %12 = vector.broadcast %8 : vector<256x1xi32> to vector<256x16xi32>
    %13 = arith.cmpi eq, %12, %11 : vector<256x16xi32>
    %14 = arith.extui %13 : vector<256x16xi1> to vector<256x16xi32>
    %15 = arith.sitofp %14 : vector<256x16xi32> to vector<256x16xf32>
    %16 = arith.truncf %15 : vector<256x16xf32> to vector<256x16xbf16>
    %c0_11 = arith.constant 0 : index
    %c0_12 = arith.constant 0 : index
    %17 = vector.load %arg15[%c0_11, %c0_12] : memref<16x96xbf16, #tpu.memory_space<vmem>>, vector<16x96xbf16>
    %cst = arith.constant dense<0.000000e+00> : vector<256x96xf32>
    %18 = tpu.matmul %16, %17, %cst {dimension_numbers = #tpu.dot_dimension_numbers<[1], [0], [0], [1], [0, 0, 1, 1], [], []>} : vector<256x16xbf16>, vector<16x96xbf16>, vector<256x96xf32> -> vector<256x96xf32>
    %19 = vector.extract_strided_slice %18 {offsets = [0, 0], sizes = [256, 32], strides = [1, 1]} : vector<256x96xf32> to vector<256x32xf32>
    %20 = vector.extract_strided_slice %10 {offsets = [0, 0], sizes = [256, 1], strides = [1, 1]} : vector<256x2xf32> to vector<256x1xf32>
    %21 = vector.extract_strided_slice %18 {offsets = [0, 32], sizes = [256, 32], strides = [1, 1]} : vector<256x96xf32> to vector<256x32xf32>
    %22 = vector.broadcast %20 : vector<256x1xf32> to vector<256x32xf32>
    %23 = arith.mulf %22, %21 : vector<256x32xf32>
    %24 = arith.addf %19, %23 : vector<256x32xf32>
    %25 = vector.extract_strided_slice %10 {offsets = [0, 1], sizes = [256, 1], strides = [1, 1]} : vector<256x2xf32> to vector<256x1xf32>
    %26 = vector.extract_strided_slice %18 {offsets = [0, 64], sizes = [256, 32], strides = [1, 1]} : vector<256x96xf32> to vector<256x32xf32>
    %27 = vector.broadcast %25 : vector<256x1xf32> to vector<256x32xf32>
    %28 = arith.mulf %27, %26 : vector<256x32xf32>
    %29 = arith.addf %24, %28 : vector<256x32xf32>
    %c0_13 = arith.constant 0 : index
    %c0_14 = arith.constant 0 : index
    %30 = vector.load %arg18[%c0_13, %c0_14] : memref<16x256xi32, #tpu.memory_space<vmem>>, vector<16x256xi32>
    %31 = vector.broadcast %9 : vector<1x256xi32> to vector<16x256xi32>
    %32 = arith.cmpi eq, %30, %31 : vector<16x256xi32>
    %33 = arith.extui %32 : vector<16x256xi1> to vector<16x256xi32>
    %34 = arith.sitofp %33 : vector<16x256xi32> to vector<16x256xf32>
    %35 = arith.truncf %34 : vector<16x256xf32> to vector<16x256xbf16>
    %c0_15 = arith.constant 0 : index
    %c0_16 = arith.constant 0 : index
    %36 = vector.load %arg16[%c0_15, %c0_16] : memref<16x32xf32, #tpu.memory_space<vmem>>, vector<16x32xf32>
    %37 = arith.truncf %29 : vector<256x32xf32> to vector<256x32xbf16>
    %cst_17 = arith.constant dense<0.000000e+00> : vector<16x32xf32>
    %38 = tpu.matmul %35, %37, %cst_17 {dimension_numbers = #tpu.dot_dimension_numbers<[1], [0], [0], [1], [0, 0, 1, 1], [], []>} : vector<16x256xbf16>, vector<256x32xbf16>, vector<16x32xf32> -> vector<16x32xf32>
    %39 = arith.addf %36, %38 : vector<16x32xf32>
    %c0_18 = arith.constant 0 : index
    %c0_19 = arith.constant 0 : index
    %40 = vector.load %arg16[%c0_18, %c0_19] : memref<16x32xf32, #tpu.memory_space<vmem>>, vector<16x32xf32>
    tpu.vector_store %arg16[%c0_18, %c0_19], %39 {strides = array<i32>} : memref<16x32xf32, #tpu.memory_space<vmem>>, vector<16x32xf32>,
    %c0_i32_20 = arith.constant 0 : i32
    %41 = arith.cmpi eq, %arg1, %c0_i32_20 : i32
    %c2_i32 = arith.constant 2 : i32
    %42 = arith.cmpi slt, %arg0, %c2_i32 : i32
    %43 = arith.andi %41, %42 : i1
    %44 = arith.extui %43 : i1 to i32
    %c0_i32_21 = arith.constant 0 : i32
    %45 = arith.cmpi ne, %44, %c0_i32_21 : i32
    scf.if %45 {
      %c0_24 = arith.constant 0 : index
      %c0_25 = arith.constant 0 : index
      %50 = vector.load %arg16[%c0_24, %c0_25] : memref<16x32xf32, #tpu.memory_space<vmem>>, vector<16x32xf32>
      %cst_26 = arith.constant 0.000000e+00 : f32
      %51 = vector.broadcast %cst_26 : f32 to vector<16x32xf32>
      %52 = arith.maximumf %50, %51 : vector<16x32xf32>
      %c0_27 = arith.constant 0 : index
      %c0_28 = arith.constant 0 : index
      %53 = vector.load %arg14[%c0_27, %c0_28] : memref<16x32xf32, #tpu.memory_space<vmem>>, vector<16x32xf32>
      tpu.vector_store %arg14[%c0_27, %c0_28], %52 {strides = array<i32>} : memref<16x32xf32, #tpu.memory_space<vmem>>, vector<16x32xf32>,
    } else {
    }
    %c2_i32_22 = arith.constant 2 : i32
    %46 = arith.cmpi eq, %arg0, %c2_i32_22 : i32
    %47 = arith.andi %41, %46 : i1
    %48 = arith.extui %47 : i1 to i32
    %c0_i32_23 = arith.constant 0 : i32
    %49 = arith.cmpi ne, %48, %c0_i32_23 : i32
    scf.if %49 {
      %c0_24 = arith.constant 0 : index
      %c0_25 = arith.constant 0 : index
      %50 = vector.load %arg16[%c0_24, %c0_25] : memref<16x32xf32, #tpu.memory_space<vmem>>, vector<16x32xf32>
      %cst_26 = arith.constant 0.000000e+00 : f32
      %51 = vector.broadcast %cst_26 : f32 to vector<16x32xf32>
      %52 = arith.maximumf %50, %51 : vector<16x32xf32>
      %53 = arith.truncf %52 : vector<16x32xf32> to vector<16x32xbf16>
      %c0_27 = arith.constant 0 : index
      %c0_28 = arith.constant 0 : index
      %54 = vector.load %arg9[%c0_27, %c0_28] : memref<32x32xbf16, #tpu.memory_space<vmem>>, vector<32x32xbf16>
      %cst_29 = arith.constant dense<0.000000e+00> : vector<16x32xf32>
      %55 = tpu.matmul %53, %54, %cst_29 {dimension_numbers = #tpu.dot_dimension_numbers<[1], [0], [0], [1], [0, 0, 1, 1], [], []>} : vector<16x32xbf16>, vector<32x32xbf16>, vector<16x32xf32> -> vector<16x32xf32>
      %c0_30 = arith.constant 0 : index
      %c0_31 = arith.constant 0 : index
      %56 = vector.load %arg10[%c0_30, %c0_31] : memref<1x32xf32, #tpu.memory_space<vmem>>, vector<1x32xf32>
      %57 = vector.broadcast %56 : vector<1x32xf32> to vector<16x32xf32>
      %58 = arith.addf %55, %57 : vector<16x32xf32>
      %cst_32 = arith.constant 0.000000e+00 : f32
      %59 = vector.broadcast %cst_32 : f32 to vector<16x32xf32>
      %60 = arith.maximumf %58, %59 : vector<16x32xf32>
      %61 = arith.truncf %60 : vector<16x32xf32> to vector<16x32xbf16>
      %c0_33 = arith.constant 0 : index
      %c0_34 = arith.constant 0 : index
      %62 = vector.load %arg11[%c0_33, %c0_34] : memref<32x128xbf16, #tpu.memory_space<vmem>>, vector<32x128xbf16>
      %cst_35 = arith.constant dense<0.000000e+00> : vector<16x128xf32>
      %63 = tpu.matmul %61, %62, %cst_35 {dimension_numbers = #tpu.dot_dimension_numbers<[1], [0], [0], [1], [0, 0, 1, 1], [], []>} : vector<16x32xbf16>, vector<32x128xbf16>, vector<16x128xf32> -> vector<16x128xf32>
      %c0_36 = arith.constant 0 : index
      %c0_37 = arith.constant 0 : index
      %64 = vector.load %arg12[%c0_36, %c0_37] : memref<1x128xf32, #tpu.memory_space<vmem>>, vector<1x128xf32>
      %65 = vector.broadcast %64 : vector<1x128xf32> to vector<16x128xf32>
      %66 = arith.addf %63, %65 : vector<16x128xf32>
      %c0_38 = arith.constant 0 : index
      %c0_39 = arith.constant 0 : index
      %67 = vector.load %arg13[%c0_38, %c0_39] : memref<16x128xf32, #tpu.memory_space<vmem>>, vector<16x128xf32>
      tpu.vector_store %arg13[%c0_38, %c0_39], %66 {strides = array<i32>} : memref<16x128xf32, #tpu.memory_space<vmem>>, vector<16x128xf32>,
    } else {
    }
    return
  }
  func.func @transform_0(%arg0: i32, %arg1: i32) -> (i32, i32) {
    %c0_i32 = arith.constant 0 : i32
    %c0_i32_0 = arith.constant 0 : i32
    return %arg1, %c0_i32 : i32, i32
  }
  func.func @transform_1(%arg0: i32, %arg1: i32) -> (i32, i32) {
    %c0_i32 = arith.constant 0 : i32
    %c0_i32_0 = arith.constant 0 : i32
    return %c0_i32, %arg1 : i32, i32
  }
  func.func @transform_2(%arg0: i32, %arg1: i32) -> (i32, i32) {
    %c0_i32 = arith.constant 0 : i32
    %c0_i32_0 = arith.constant 0 : i32
    return %arg1, %c0_i32 : i32, i32
  }
  func.func @transform_3(%arg0: i32, %arg1: i32) -> (i32, i32) {
    %c0_i32 = arith.constant 0 : i32
    %c0_i32_0 = arith.constant 0 : i32
    %c0_i32_1 = arith.constant 0 : i32
    return %c0_i32, %c0_i32_0 : i32, i32
  }
  func.func @transform_4(%arg0: i32, %arg1: i32) -> (i32, i32, i32) {
    %c0_i32 = arith.constant 0 : i32
    %c0_i32_0 = arith.constant 0 : i32
    %c0_i32_1 = arith.constant 0 : i32
    return %arg0, %c0_i32, %c0_i32_0 : i32, i32, i32
  }
  func.func @transform_5(%arg0: i32, %arg1: i32) -> (i32, i32, i32) {
    %c0_i32 = arith.constant 0 : i32
    %c0_i32_0 = arith.constant 0 : i32
    %c0_i32_1 = arith.constant 0 : i32
    return %arg0, %c0_i32, %c0_i32_0 : i32, i32, i32
  }
  func.func @transform_6(%arg0: i32, %arg1: i32) -> (i32, i32, i32) {
    %c0_i32 = arith.constant 0 : i32
    %c0_i32_0 = arith.constant 0 : i32
    %c0_i32_1 = arith.constant 0 : i32
    return %arg0, %c0_i32, %c0_i32_0 : i32, i32, i32
  }
  func.func @transform_7(%arg0: i32, %arg1: i32) -> (i32, i32) {
    %c0_i32 = arith.constant 0 : i32
    %c0_i32_0 = arith.constant 0 : i32
    %c0_i32_1 = arith.constant 0 : i32
    return %c0_i32, %c0_i32_0 : i32, i32
  }
  func.func @transform_8(%arg0: i32, %arg1: i32) -> (i32, i32) {
    %c0_i32 = arith.constant 0 : i32
    %c0_i32_0 = arith.constant 0 : i32
    %c0_i32_1 = arith.constant 0 : i32
    return %c0_i32, %c0_i32_0 : i32, i32
  }
  func.func @transform_9(%arg0: i32, %arg1: i32) -> (i32, i32) {
    %c0_i32 = arith.constant 0 : i32
    %c0_i32_0 = arith.constant 0 : i32
    %c0_i32_1 = arith.constant 0 : i32
    return %c0_i32, %c0_i32_0 : i32, i32
  }
  func.func @transform_10(%arg0: i32, %arg1: i32) -> (i32, i32) {
    %c0_i32 = arith.constant 0 : i32
    %c0_i32_0 = arith.constant 0 : i32
    %c0_i32_1 = arith.constant 0 : i32
    return %c0_i32, %c0_i32_0 : i32, i32
  }
  func.func @transform_11(%arg0: i32, %arg1: i32) -> (i32, i32) {
    %c0_i32 = arith.constant 0 : i32
    %c0_i32_0 = arith.constant 0 : i32
    %c0_i32_1 = arith.constant 0 : i32
    return %c0_i32, %c0_i32_0 : i32, i32
  }
}

</mosaic_0001>

<bundles_post_ra>
// kernel: tpu_custom_call.1
= control target key start
LH: loop header
LB: loop body
LE: loop exit
PB: predicated region body
PF: predicated region fallthrough
CT: control target
= control target key end

     0   :  { %16 = vsyncpa [#allocation8], 0  ;;  %s2635_s17 = smov 0   ;;  %s2637_s18 = smov 0   ;;  %s3512_s0 = inlined_call_operand.vmem [shape: s32[256,1], index: 0, kind: input, shape index: {}]   ;;  %s3513_s1 = inlined_call_operand.vmem [shape: s32[1,256], index: 1, kind: input, shape index: {}]   ;;  %s3514_s2 = inlined_call_operand.vmem [shape: f32[256,2], index: 2, kind: input, shape index: {}]   ;;  %s3515_s3 = inlined_call_operand.vmem [shape: f32[16,32], index: 3, kind: input, shape index: {}]   ;;  %s3516_s4 = inlined_call_operand.vmem [shape: bf16[3,32,96], index: 4, kind: input, shape index: {}]   ;;  %s3517_s5 = inlined_call_operand.vmem [shape: bf16[3,32,32], index: 5, kind: input, shape index: {}]   ;;  %s3518_s6 = inlined_call_operand.vmem [shape: f32[3,1,32], index: 6, kind: input, shape index: {}]   ;;  %s3519_s7 = inlined_call_operand.vmem [shape: bf16[32,32], index: 7, kind: input, shape index: {}]   ;;  %s3520_s8 = inlined_call_operand.vmem [shape: f32[1,32], index: 8, kind: input, shape index: {}]   ;;  %s3521_s9 = inlined_call_operand.vmem [shape: bf16[32,128], index: 9, kind: input, shape index: {}]   ;;  %s3522_s10 = inlined_call_operand.vmem [shape: f32[1,128], index: 10, kind: input, shape index: {}]   ;;  %s3523_s11 = inlined_call_operand.hbm [shape: f32[16,128], index: 11, kind: output, shape index: {}]  }
   0x1   :  { %s2639_s19 = smov 0  }
   0x2 LB: > { %s34_s21 = sadd.s32 1, %s2557_s18  ;;  %p2236_p1 = scmp.ge.s32.totalorder %s2561_s19, 1  ;;  %s2561_s19 = sphi %s2639_s19, %s22_s19   ;;  %s2557_s18 = sphi %s2637_s18, %s3545_s18   ;;  %s2553_s17 = sphi %s2635_s17, %s3544_s17  }
   0x3   : > { %p36_p0 = scmp.ge.s32.totalorder %s34_s21, 3  ;;  %p395_p2 = scmp.lt.s32.totalorder %s2561_s19, 4 }
   0x5   : > { %s3547_s21 = smov (%p36_p0, %s34_s21), 0  ;;  %p396_p3 = pnand %p2236_p1, %p395_p2 }
   0x7   : > { %399 = sbr.rel (%p396_p3) target bundleno = 1448 (0x5a8), region = 64 }
   0xe   : > { %p469_p4 = scmp.lt.s32.totalorder %s2553_s17, 2  ;;  %p483_p5 = scmp.eq.s32.totalorder %s2553_s17, 0 }
   0xf   : > { %v489_v0 = vld [vmem:[%s3515_s3] sm:$0xff] (%p483_p5)  ;;  %vm491_vm0 = vcmask (%p483_p5), 261120   ;;  %v490_v1 = vld [vmem:[%s3515_s3 + $0x8] sm:$0xff] (%p483_p5)  ;;  %v494_v2 = vlaneseq (%p483_p5)  ;;  %vm496_vm1 = vcmask (%p483_p5), 130048  }
  0x10   : > { %s2661_s22 = scalar_select %p469_p4, %s2553_s17, 2 }
  0x11   : > { %488 = sbr.rel (!%p483_p5) target bundleno = 37 (0x25), region = 68  ;;  %492 = vst.msk [vmem:[#allocation2] sm:$0xff] (%p483_p5), %vm491_vm0, %v489_v0  ;;  %493 = vst.msk [vmem:[#allocation2 + $0x8] sm:$0xff] (%p483_p5), %vm491_vm0, %v490_v1  ;;  %v495_v3 = vand.u32 (%p483_p5), 127, %v494_v2  ;;  %v530_v4 = vshrl.u32 (%p483_p5), %v494_v2, 7 }
  0x12   : > { %s2319_s23 = sshll.u32 %s2661_s22, 4  ;;  %s481_s26 = scalar_lea.vmem %s3518_s6, %s2661_s22 }
  0x13   : > { %s2671_s29 = scalar_lea.vmem %s3516_s4, %s2319_s23  ;;  %s2676_s13 = scalar_lea.vmem %s3517_s5, %s2319_s23  ;;  %497 = vst.msk [vmem:[#allocation5] sm:$0xff] (%p483_p5), %vm496_vm1, %v495_v3  ;;  %498 = vst.msk [vmem:[#allocation5 + $0x8] sm:$0xff] (%p483_p5), %vm496_vm1, %v495_v3  ;;  %v531_v5 = vadd.s32 (%p483_p5), 8, %v530_v4 }
  0x14   : > { %499 = vst.msk [vmem:[#allocation5 + $0x10] sm:$0xff] (%p483_p5), %vm496_vm1, %v495_v3  ;;  %500 = vst.msk [vmem:[#allocation5 + $0x18] sm:$0xff] (%p483_p5), %vm496_vm1, %v495_v3 }
  0x15   : > { %501 = vst.msk [vmem:[#allocation5 + $0x20] sm:$0xff] (%p483_p5), %vm496_vm1, %v495_v3  ;;  %502 = vst.msk [vmem:[#allocation5 + $0x28] sm:$0xff] (%p483_p5), %vm496_vm1, %v495_v3 }
  0x16   : > { %503 = vst.msk [vmem:[#allocation5 + $0x30] sm:$0xff] (%p483_p5), %vm496_vm1, %v495_v3  ;;  %504 = vst.msk [vmem:[#allocation5 + $0x38] sm:$0xff] (%p483_p5), %vm496_vm1, %v495_v3 }
  0x17   : > { %505 = vst.msk [vmem:[#allocation5 + $0x40] sm:$0xff] (%p483_p5), %vm496_vm1, %v495_v3  ;;  %506 = vst.msk [vmem:[#allocation5 + $0x48] sm:$0xff] (%p483_p5), %vm496_vm1, %v495_v3 }
  0x18   : > { %507 = vst.msk [vmem:[#allocation5 + $0x50] sm:$0xff] %vm496_vm1, %v495_v3  ;;  %508 = vst.msk [vmem:[#allocation5 + $0x58] sm:$0xff] %vm496_vm1, %v495_v3 }
  0x19   : > { %509 = vst.msk [vmem:[#allocation5 + $0x60] sm:$0xff] %vm496_vm1, %v495_v3  ;;  %510 = vst.msk [vmem:[#allocation5 + $0x68] sm:$0xff] %vm496_vm1, %v495_v3 }
  0x1a   : > { %511 = vst.msk [vmem:[#allocation5 + $0x70] sm:$0xff] %vm496_vm1, %v495_v3  ;;  %512 = vst.msk [vmem:[#allocation5 + $0x78] sm:$0xff] %vm496_vm1, %v495_v3 }
  0x1b   : > { %513 = vst.msk [vmem:[#allocation5 + $0x80] sm:$0xff] %vm496_vm1, %v495_v3  ;;  %514 = vst.msk [vmem:[#allocation5 + $0x88] sm:$0xff] %vm496_vm1, %v495_v3 }
  0x1c   : > { %515 = vst.msk [vmem:[#allocation5 + $0x90] sm:$0xff] %vm496_vm1, %v495_v3  ;;  %516 = vst.msk [vmem:[#allocation5 + $0x98] sm:$0xff] %vm496_vm1, %v495_v3 }
  0x1d   : > { %517 = vst.msk [vmem:[#allocation5 + $0xa0] sm:$0xff] %vm496_vm1, %v495_v3  ;;  %518 = vst.msk [vmem:[#allocation5 + $0xa8] sm:$0xff] %vm496_vm1, %v495_v3 }
  0x1e   : > { %519 = vst.msk [vmem:[#allocation5 + $0xb0] sm:$0xff] %vm496_vm1, %v495_v3  ;;  %520 = vst.msk [vmem:[#allocation5 + $0xb8] sm:$0xff] %vm496_vm1, %v495_v3 }
  0x1f   : > { %521 = vst.msk [vmem:[#allocation5 + $0xc0] sm:$0xff] %vm496_vm1, %v495_v3  ;;  %522 = vst.msk [vmem:[#allocation5 + $0xc8] sm:$0xff] %vm496_vm1, %v495_v3 }
  0x20   : > { %523 = vst.msk [vmem:[#allocation5 + $0xd0] sm:$0xff] %vm496_vm1, %v495_v3  ;;  %524 = vst.msk [vmem:[#allocation5 + $0xd8] sm:$0xff] %vm496_vm1, %v495_v3 }
  0x21   : > { %525 = vst.msk [vmem:[#allocation5 + $0xe0] sm:$0xff] %vm496_vm1, %v495_v3  ;;  %526 = vst.msk [vmem:[#allocation5 + $0xe8] sm:$0xff] %vm496_vm1, %v495_v3 }
  0x22   : > { %527 = vst.msk [vmem:[#allocation5 + $0xf0] sm:$0xff] %vm496_vm1, %v495_v3  ;;  %528 = vst.msk [vmem:[#allocation5 + $0xf8] sm:$0xff] %vm496_vm1, %v495_v3 }
  0x23   : > { %532 = vst [vmem:[#allocation6] sm:$0xff] %v530_v4  ;;  %533 = vst [vmem:[#allocation6 + $0x8] sm:$0xff] %v530_v4 }
  0x24   : > { %534 = vst [vmem:[#allocation6 + $0x10] sm:$0xff] %v531_v5  ;;  %535 = vst [vmem:[#allocation6 + $0x18] sm:$0xff] %v531_v5 }
  0x25 PF: > { %v2501_v6 = vld [vmem:[%s2676_s13] sm:$0xff]   ;;  %v2563_v7 = vmov 0.0   ;;  %v2502_v8 = vld [vmem:[%s2676_s13 + $0x8] sm:$0xff]   ;;  %vm2564_vm2 = vmmov 0   ;;  %v2565_v11 = vmov 0   ;;  %vm565_vm3 = vcmask 261120  }
  0x26   : > { %2375 = vmatprep.subr.bf16.mxu1 %v2563_v7  ;;  %2379 = vmatprep.mubr.msk.bf16.mxu1 %vm2564_vm2, %v2563_v7  ;;  %v539_v9 = vld [vmem:[#allocation2] sm:$0xff]  ;;  %v540_v10 = vld [vmem:[#allocation2 + $0x8] sm:$0xff]  ;;  %v674_v16 = vld [vmem:[%s3512_s0 + $0x10] sm:$0xff]  ;;  %v2566_v53 = vmov 1   ;;  %vm978_vm6 = vcmask 130048   ;;  %vm670_vm7 = vcmask 785408  }
  0x27   : > { %2376 = vmatpush3.bf16.msra.mxu1 %v2501_v6  ;;  %2483 = vset.pattern.permute.xlu0 %v2565_v11  ;;  %v672_v12 = vld [vmem:[%s3512_s0] sm:$0xff]  ;;  %v541_v13 = vpack.c.bf16 %v540_v10, %v539_v9  ;;  %v673_v14 = vld [vmem:[%s3512_s0 + $0x8] sm:$0xff]  ;;  %v675_v18 = vld [vmem:[%s3512_s0 + $0x18] sm:$0xff]  ;;  %s2567_s22 = smov 96  }
  0x28   : > { %2377 = vmatprep.subr.bf16.mxu1 %v2563_v7  ;;  %770 = vperm.xlu0 %2483, %v672_v12   ;;  %v2503_v15 = vld [vmem:[%s2671_s29] sm:$0xff]   ;;  %v2504_v19 = vld [vmem:[%s2671_s29 + $0x8] sm:$0xff]   ;;  %v678_v20 = vld [vmem:[%s3512_s0 + $0x30] sm:$0xff] }
  0x29   : > { %2484 = vset.pattern.permute.xlu1 %v2565_v11  ;;  %v676_v17 = vld [vmem:[%s3512_s0 + $0x20] sm:$0xff]  ;;  %v677_v21 = vld [vmem:[%s3512_s0 + $0x28] sm:$0xff]  ;;  %v679_v23 = vld [vmem:[%s3512_s0 + $0x38] sm:$0xff] }
  0x2a   : > { %776 = vperm.xlu1 %2484, %v674_v16   ;;  %v680_v22 = vld [vmem:[%s3512_s0 + $0x40] sm:$0xff]  ;;  %v682_v24 = vld [vmem:[%s3512_s0 + $0x50] sm:$0xff]  ;;  %v681_v25 = vld [vmem:[%s3512_s0 + $0x48] sm:$0xff] }
  0x2b   : > { %2378 = vmatpush3.bf16.msra.mxu1 %v2502_v8  ;;  %v684_v26 = vld [vmem:[%s3512_s0 + $0x60] sm:$0xff]  ;;  %v683_v27 = vld [vmem:[%s3512_s0 + $0x58] sm:$0xff]  ;;  %v686_v28 = vld [vmem:[%s3512_s0 + $0x70] sm:$0xff] }
  0x2c   : > { %2383 = vmatprep.subr.bf16.mxu1 %v2563_v7  ;;  %773 = vperm.xlu0 %2483, %v673_v14   ;;  %v685_v29 = vld [vmem:[%s3512_s0 + $0x68] sm:$0xff]  ;;  %v688_v30 = vld [vmem:[%s3512_s0 + $0x80] sm:$0xff]  ;;  %v687_v31 = vld [vmem:[%s3512_s0 + $0x78] sm:$0xff] }
  0x2d   : > { %v690_v32 = vld [vmem:[%s3512_s0 + $0x90] sm:$0xff]  ;;  %v689_v33 = vld [vmem:[%s3512_s0 + $0x88] sm:$0xff]  ;;  %v692_v34 = vld [vmem:[%s3512_s0 + $0xa0] sm:$0xff] }
  0x2e   : > { %2380 = vmatmul.mubr.msk.bf16.vlgmr.msra.gmra.mrb[0].mxu1 %vm565_vm3, %v541_v13  ;;  %779 = vperm.xlu1 %2484, %v675_v18   ;;  %v691_v35 = vld [vmem:[%s3512_s0 + $0x98] sm:$0xff]  ;;  %v694_v36 = vld [vmem:[%s3512_s0 + $0xb0] sm:$0xff]  ;;  %v693_v37 = vld [vmem:[%s3512_s0 + $0xa8] sm:$0xff] }
  0x2f   : > { %2384 = vmatpush3.bf16.msra.mxu1 %v2503_v15  ;;  %2387 = vmatprep.mubr.msk.bf16.mxu1 %vm2564_vm2, %v2563_v7  ;;  %v696_v38 = vld [vmem:[%s3512_s0 + $0xc0] sm:$0xff]  ;;  %v695_v39 = vld [vmem:[%s3512_s0 + $0xb8] sm:$0xff]  ;;  %v698_v40 = vld [vmem:[%s3512_s0 + $0xd0] sm:$0xff] }
  0x30   : > { %2385 = vmatprep.subr.bf16.mxu1 %v2563_v7  ;;  %782 = vperm.xlu0 %2483, %v676_v17   ;;  %v697_v41 = vld [vmem:[%s3512_s0 + $0xc8] sm:$0xff]  ;;  %v700_v42 = vld [vmem:[%s3512_s0 + $0xe0] sm:$0xff]  ;;  %v699_v43 = vld [vmem:[%s3512_s0 + $0xd8] sm:$0xff] }
  0x31   : > { %v702_v44 = vld [vmem:[%s3512_s0 + $0xf0] sm:$0xff]  ;;  %v701_v45 = vld [vmem:[%s3512_s0 + $0xe8] sm:$0xff]  ;;  %v705_v46 = vld [vmem:[%s3514_s2] sm:$0xff] }
  0x32   : > { %785 = vperm.xlu1 %2484, %v677_v21   ;;  %v703_v47 = vld [vmem:[%s3512_s0 + $0xf8] sm:$0xff]  ;;  %v722_v48 = vld [vmem:[%s3514_s2 + $0x88] sm:$0xff]  ;;  %v721_v49 = vld [vmem:[%s3514_s2 + $0x80] sm:$0xff] }
  0x33   : > { %2386 = vmatpush3.bf16.msra.mxu1 %v2504_v19  ;;  %v724_v50 = vld [vmem:[%s3514_s2 + $0x98] sm:$0xff]  ;;  %v706_v51 = vld [vmem:[%s3514_s2 + $0x8] sm:$0xff]  ;;  %v723_v56 = vld [vmem:[%s3514_s2 + $0x90] sm:$0xff] }
  0x34   : > { %788 = vperm.xlu0 %2483, %v678_v20   ;;  %v726_v52 = vld [vmem:[%s3514_s2 + $0xa8] sm:$0xff]  ;;  %v728_v54 = vld [vmem:[%s3514_s2 + $0xb8] sm:$0xff]  ;;  %v707_v58 = vld [vmem:[%s3514_s2 + $0x10] sm:$0xff] }
  0x35   : > { %v2853_v55 = vld [vmem:[%s3514_s2 + $0xc8] sm:$0xff]  ;;  %v2862_v57 = vld [vmem:[%s3514_s2 + $0xd8] sm:$0xff]  ;;  %v725_v62 = vld [vmem:[%s3514_s2 + $0xa0] sm:$0xff] }
  0x36   : > { %2388 = vmatmul.mubr.msk.bf16.vlgmr.msra.gmra.mrb[4].mxu1 %vm565_vm3, %v541_v13  ;;  %791 = vperm.xlu1 %2484, %v679_v23   ;;  %v2872_v59 = vld [vmem:[%s3514_s2 + $0xe8] sm:$0xff]  ;;  %v708_v60 = vld [vmem:[%s3514_s2 + $0x18] sm:$0xff]  ;;  %v709_v63 = vld [vmem:[%s3514_s2 + $0x20] sm:$0xff] }
  0x37   : > { %v2881_v61 = vld [vmem:[%s3514_s2 + $0xf8] sm:$0xff]  ;;  %v710_v0 = vld [vmem:[%s3514_s2 + $0x28] sm:$0xff]  ;;  %v727_v1 = vld [vmem:[%s3514_s2 + $0xb0] sm:$0xff] }
  0x38   : > { %794 = vperm.xlu0 %2483, %v680_v22   ;;  %v737_v2 = vld [vmem:[#allocation5] sm:$0xff]  ;;  %v712_v4 = vld [vmem:[%s3514_s2 + $0x38] sm:$0xff]  ;;  %v738_v5 = vld [vmem:[#allocation5 + $0x8] sm:$0xff] }
  0x39   : > { %v711_v9 = vld [vmem:[%s3514_s2 + $0x30] sm:$0xff]  ;;  %v729_v13 = vld [vmem:[%s3514_s2 + $0xc0] sm:$0xff]  ;;  %v714_v14 = vld [vmem:[%s3514_s2 + $0x48] sm:$0xff] }
  0x3a   : > { %797 = vperm.xlu1 %2484, %v681_v25   ;;  %v713_v15 = vld [vmem:[%s3514_s2 + $0x40] sm:$0xff]  ;;  %v731_v16 = vld [vmem:[%s3514_s2 + $0xd0] sm:$0xff]  ;;  %v716_v17 = vld [vmem:[%s3514_s2 + $0x58] sm:$0xff] }
  0x3b   : > { %v733_v18 = vld [vmem:[%s3514_s2 + $0xe0] sm:$0xff]  ;;  %v718_v19 = vld [vmem:[%s3514_s2 + $0x68] sm:$0xff]  ;;  %v715_v20 = vld [vmem:[%s3514_s2 + $0x50] sm:$0xff] }
  0x3c   : > { %800 = vperm.xlu0 %2483, %v682_v24   ;;  %v735_v21 = vld [vmem:[%s3514_s2 + $0xf0] sm:$0xff]  ;;  %v720_v22 = vld [vmem:[%s3514_s2 + $0x78] sm:$0xff]  ;;  %v717_v24 = vld [vmem:[%s3514_s2 + $0x60] sm:$0xff] }
  0x3e   : > { %803 = vperm.xlu1 %2484, %v683_v27  }
  0x40   : > { %806 = vperm.xlu0 %2483, %v684_v26  }
  0x42   : > { %809 = vperm.xlu1 %2484, %v685_v29   ;;  %v2242_v29 = vld [vmem:[%s481_s26] ss:$0 sm:$0xff]  ;;  %s2568_s26 = smov 64  }
  0x44   : > { %812 = vperm.xlu0 %2483, %v686_v28  }
  0x46   : > { %815 = vperm.xlu1 %2484, %v687_v31  }
  0x48   : > { %818 = vperm.xlu0 %2483, %v688_v30  }
  0x4a   : > { %821 = vperm.xlu1 %2484, %v689_v33  }
  0x4c   : > { %824 = vperm.xlu0 %2483, %v690_v32  }
  0x4e   : > { %827 = vperm.xlu1 %2484, %v691_v35  }
  0x50   : > { %830 = vperm.xlu0 %2483, %v692_v34  }
  0x52   : > { %833 = vperm.xlu1 %2484, %v693_v37  }
  0x54   : > { %836 = vperm.xlu0 %2483, %v694_v36  }
  0x56   : > { %839 = vperm.xlu1 %2484, %v695_v39  }
  0x58   : > { %842 = vperm.xlu0 %2483, %v696_v38   ;;  %v719_v38 = vld [vmem:[%s3514_s2 + $0x70] sm:$0xff] }
  0x5a   : > { %845 = vperm.xlu1 %2484, %v697_v41  }
  0x5c   : > { %848 = vperm.xlu0 %2483, %v698_v40  }
  0x5e   : > { %851 = vperm.xlu1 %2484, %v699_v43  }
  0x60   : > { %854 = vperm.xlu0 %2483, %v700_v42  }
  0x62   : > { %857 = vperm.xlu1 %2484, %v701_v45  }
  0x64   : > { %860 = vperm.xlu0 %2483, %v702_v44  }
  0x66   : > { %863 = vperm.xlu1 %2484, %v703_v47   ;;  %v739_v47 = vld [vmem:[#allocation5 + $0x10] sm:$0xff] }
  0x68   : > { %1190 = vperm.xlu0 %2483, %v705_v46  }
  0x6a   : > { %1270 = vperm.xlu1 %2484, %v721_v49  }
  0x6c   : > { %1275 = vperm.xlu0 %2483, %v722_v48  }
  0x6e   : > { %1195 = vperm.xlu1 %2484, %v706_v51  }
  0x70   : > { %1285 = vperm.xlu0 %2483, %v724_v50  }
  0x72   : > { %2485 = vset.pattern.permute.xlu1 %v2566_v53 }
  0x73   : > { %1609 = vperm.xlu1 %2485, %v722_v48   ;;  %v740_v48 = vld [vmem:[#allocation5 + $0x18] sm:$0xff] }
  0x74   : > { %1295 = vperm.xlu0 %2483, %v726_v52  }
  0x77   : > { %1541 = vperm.xlu1 %2485, %v705_v46  }
  0x78   : > { %1305 = vperm.xlu0 %2483, %v728_v54  }
  0x7b   : > { %2486 = vset.pattern.permute.xlu1 %v2565_v11 }
  0x7c   : > { %1315 = vperm.xlu0 %2483, %v2853_v55   ;;  %1280 = vperm.xlu1 %2486, %v723_v56  }
  0x80   : > { %1325 = vperm.xlu0 %2483, %v2862_v57   ;;  %1200 = vperm.xlu1 %2486, %v707_v58  }
  0x84   : > { %1335 = vperm.xlu0 %2483, %v2872_v59   ;;  %1205 = vperm.xlu1 %2486, %v708_v60  }
  0x88   : > { %1345 = vperm.xlu0 %2483, %v2881_v61   ;;  %2487 = vset.pattern.permute.xlu1 %v2566_v53 }
  0x89   : > { %1617 = vperm.xlu1 %2487, %v724_v50   ;;  %v742_v50 = vld [vmem:[#allocation5 + $0x28] sm:$0xff] }
  0x8c   : > { %2499 = vset.pattern.permute.xlu0 %v2566_v53 }
  0x8d   : > { %1605 = vperm.xlu0 %2499, %v721_v49   ;;  %1549 = vperm.xlu1 %2487, %v707_v58   ;;  %v741_v49 = vld [vmem:[#allocation5 + $0x20] sm:$0xff]  ;;  %v743_v58 = vld [vmem:[#allocation5 + $0x30] sm:$0xff] }
  0x91   : > { %1545 = vperm.xlu0 %2499, %v706_v51   ;;  %2488 = vset.pattern.permute.xlu1 %v2565_v11 }
  0x92   : > { %1290 = vperm.xlu1 %2488, %v725_v62  }
  0x95   : > { %1613 = vperm.xlu0 %2499, %v723_v56  }
  0x96   : > { %1210 = vperm.xlu1 %2488, %v709_v63  }
  0x99   : > { %1553 = vperm.xlu0 %2499, %v708_v60   ;;  %v745_v60 = vld [vmem:[#allocation5 + $0x40] sm:$0xff] }
  0x9a   : > { %1215 = vperm.xlu1 %2488, %v710_v0  }
  0x9d   : > { %1621 = vperm.xlu0 %2499, %v725_v62  }
  0x9e   : > { %2489 = vset.pattern.permute.xlu1 %v2566_v53 }
  0x9f   : > { %1625 = vperm.xlu1 %2489, %v726_v52  }
  0xa1   : > { %1561 = vperm.xlu0 %2499, %v710_v0  }
  0xa3   : > { %1557 = vperm.xlu1 %2489, %v709_v63   ;;  %v746_v63 = vld [vmem:[#allocation5 + $0x48] sm:$0xff] }
  0xa5   : > { %1629 = vperm.xlu0 %2499, %v727_v1  }
  0xa7   : > { %v771_v3 = vpop.permute.xlu0 %770  ;;  %2490 = vset.pattern.permute.xlu1 %v2565_v11 }
  0xa8   : > { %vm865_vm4 = vcmp.eq.s32.totalorder %v771_v3, %v737_v2  ;;  %1300 = vperm.xlu1 %2490, %v727_v1  }
  0xa9   : > { %1569 = vperm.xlu0 %2499, %v712_v4   ;;  %v2249_v8 = vsel %vm865_vm4, 1.0, %v2563_v7  ;;  %v777_v23 = vpop.permute.xlu1 %776 }
  0xaa   : > { %vm867_vm8 = vcmp.eq.s32.totalorder %v777_v23, %v739_v47  ;;  %v752_v23 = vld [vmem:[#allocation5 + $0x78] sm:$0xff] }
  0xab   : > { %v774_v6 = vpop.permute.xlu0 %773  ;;  %v760_v47 = vld [vmem:[#allocation5 + $0xb8] sm:$0xff] }
  0xac   : > { %vm866_vm5 = vcmp.eq.s32.totalorder %v774_v6, %v738_v5  ;;  %1220 = vperm.xlu1 %2490, %v711_v9  }
  0xad   : > { %v2250_v10 = vsel %vm866_vm5, 1.0, %v2563_v7  ;;  %1637 = vperm.xlu0 %2499, %v729_v13   ;;  %v780_v25 = vpop.permute.xlu1 %779 }
  0xae   : > { %v961_v12 = vpack.c.bf16 %v2250_v10, %v2249_v8  ;;  %vm868_vm9 = vcmp.eq.s32.totalorder %v780_v25, %v740_v48  ;;  %v747_v8 = vld [vmem:[#allocation5 + $0x50] sm:$0xff] }
  0xaf   : > { %v783_v27 = vpop.permute.xlu0 %782 }
  0xb0   : > { %2393 = vmatprep.mubr.msk.bf16.mxu0 %vm978_vm6, %v961_v12  ;;  %1225 = vperm.xlu1 %2490, %v712_v4   ;;  %vm869_vm10 = vcmp.eq.s32.totalorder %v783_v27, %v741_v49  ;;  %v749_v12 = vld [vmem:[#allocation5 + $0x60] sm:$0xff] }
  0xb1   : > { %1577 = vperm.xlu0 %2499, %v714_v14   ;;  %v786_v26 = vpop.permute.xlu1 %785  ;;  %v761_v49 = vld [vmem:[#allocation5 + $0xc0] sm:$0xff] }
  0xb2   : > { %vm870_vm11 = vcmp.eq.s32.totalorder %v786_v26, %v742_v50  ;;  %v754_v26 = vld [vmem:[#allocation5 + $0x88] sm:$0xff] }
  0xb3   : > { %v789_v30 = vpop.permute.xlu0 %788 }
  0xb4   : > { %2491 = vset.pattern.permute.xlu1 %v2566_v53  ;;  %vm871_vm12 = vcmp.eq.s32.totalorder %v789_v30, %v743_v58 }
  0xb5   : > { %1633 = vperm.xlu1 %2491, %v728_v54   ;;  %1645 = vperm.xlu0 %2499, %v731_v16   ;;  %v2953_v28 = vpop.permute.xlu1 %791  ;;  %v2251_v54 = vsel %vm867_vm8, 1.0, %v2563_v7  ;;  %v2255_v2 = vsel %vm871_vm12, 1.0, %v2563_v7 }
  0xb7   : > { %v795_v39 = vpop.permute.xlu0 %794 }
  0xb8   : > { %vm873_vm14 = vcmp.eq.s32.totalorder %v795_v39, %v745_v60  ;;  %v758_v39 = vld [vmem:[#allocation5 + $0xa8] sm:$0xff]  ;;  %v764_v60 = vld [vmem:[#allocation5 + $0xd8] sm:$0xff] }
  0xb9   : > { %1565 = vperm.xlu1 %2491, %v711_v9   ;;  %1585 = vperm.xlu0 %2499, %v716_v17   ;;  %v2960_v31 = vpop.permute.xlu1 %797  ;;  %v2257_v4 = vsel %vm873_vm14, 1.0, %v2563_v7  ;;  %v748_v9 = vld [vmem:[#allocation5 + $0x58] sm:$0xff] }
  0xba   : > { %vm874_vm15 = vcmp.eq.s32.totalorder %v2960_v31, %v746_v63  ;;  %v766_v63 = vld [vmem:[#allocation5 + $0xe8] sm:$0xff] }
  0xbb   : > { %v2258_v6 = vsel %vm874_vm15, 1.0, %v2563_v7 }
  0xbd   : > { %2492 = vset.pattern.permute.xlu1 %v2565_v11  ;;  %1653 = vperm.xlu0 %2499, %v733_v18   ;;  %v2968_v40 = vpop.permute.xlu1 %803 }
  0xbe   : > { %1310 = vperm.xlu1 %2492, %v729_v13   ;;  %vm876_vm1 = vcmp.eq.s32.totalorder %v2968_v40, %v748_v9  ;;  %v768_v9 = vld [vmem:[#allocation5 + $0xf8] sm:$0xff] }
  0xc1   : > { %1593 = vperm.xlu0 %2499, %v718_v19   ;;  %v810_v46 = vpop.permute.xlu1 %809 }
  0xc2   : > { %1230 = vperm.xlu1 %2492, %v713_v15  }
  0xc5   : > { %1661 = vperm.xlu0 %2499, %v735_v21   ;;  %v2972_v52 = vpop.permute.xlu1 %815 }
  0xc6   : > { %1235 = vperm.xlu1 %2492, %v714_v14   ;;  %v750_v14 = vld [vmem:[#allocation5 + $0x68] sm:$0xff] }
  0xc7   : > { %vm878_vm4 = vcmp.eq.s32.totalorder %v810_v46, %v750_v14  ;;  %v759_v46 = vld [vmem:[#allocation5 + $0xb0] sm:$0xff] }
  0xc9   : > { %1601 = vperm.xlu0 %2499, %v720_v22   ;;  %v822_v1 = vpop.permute.xlu1 %821 }
  0xca   : > { %2493 = vset.pattern.permute.xlu1 %v2566_v53 }
  0xcb   : > { %1641 = vperm.xlu1 %2493, %v2853_v55   ;;  %v2252_v55 = vsel %vm868_vm9, 1.0, %v2563_v7  ;;  %vm882_vm9 = vcmp.eq.s32.totalorder %v822_v1, %v754_v26 }
  0xcc   : > { %v962_v62 = vpack.c.bf16 %v2252_v55, %v2251_v54 }
  0xcd   : > { %v828_v10 = vpop.permute.xlu1 %827 }
  0xcf   : > { %1573 = vperm.xlu1 %2493, %v713_v15   ;;  %v965_v15 = vpack.c.bf16 %v2258_v6, %v2257_v4 }
  0xd3   : > { %2494 = vset.pattern.permute.xlu1 %v2565_v11 }
  0xd4   : > { %1320 = vperm.xlu1 %2494, %v731_v16  }
  0xd8   : > { %1240 = vperm.xlu1 %2494, %v715_v20  }
  0xdc   : > { %1245 = vperm.xlu1 %2494, %v716_v17  }
  0xe0   : > { %2495 = vset.pattern.permute.xlu1 %v2566_v53 }
  0xe1   : > { %1649 = vperm.xlu1 %2495, %v2862_v57   ;;  %v2253_v57 = vsel %vm869_vm10, 1.0, %v2563_v7 }
  0xe5   : > { %1581 = vperm.xlu1 %2495, %v715_v20  }
  0xe9   : > { %2496 = vset.pattern.permute.xlu1 %v2565_v11 }
  0xea   : > { %1330 = vperm.xlu1 %2496, %v733_v18   ;;  %v2260_v18 = vsel %vm876_vm1, 1.0, %v2563_v7 }
  0xee   : > { %1250 = vperm.xlu1 %2496, %v717_v24  }
  0xf2   : > { %1255 = vperm.xlu1 %2496, %v718_v19   ;;  %v834_v19 = vpop.permute.xlu1 %833 }
  0xf6   : > { %2497 = vset.pattern.permute.xlu1 %v2566_v53 }
  0xf7   : > { %1657 = vperm.xlu1 %2497, %v2872_v59   ;;  %v744_v59 = vld [vmem:[#allocation5 + $0x38] sm:$0xff] }
  0xf8   : > { %vm872_vm13 = vcmp.eq.s32.totalorder %v2953_v28, %v744_v59  ;;  %v763_v59 = vld [vmem:[#allocation5 + $0xd0] sm:$0xff] }
  0xf9   : > { %v2256_v3 = vsel %vm872_vm13, 1.0, %v2563_v7  ;;  %vm886_vm13 = vcmp.eq.s32.totalorder %v834_v19, %v758_v39 }
  0xfa   : > { %v964_v13 = vpack.c.bf16 %v2256_v3, %v2255_v2 }
  0xfb   : > { %1589 = vperm.xlu1 %2497, %v717_v24   ;;  %v753_v24 = vld [vmem:[#allocation5 + $0x80] sm:$0xff] }
  0xff   : > { %2498 = vset.pattern.permute.xlu1 %v2565_v11  ;;  %v801_v11 = vpop.permute.xlu0 %800 }
 0x100   : > { %1340 = vperm.xlu1 %2498, %v735_v21   ;;  %vm875_vm0 = vcmp.eq.s32.totalorder %v801_v11, %v747_v8  ;;  %v2262_v21 = vsel %vm878_vm4, 1.0, %v2563_v7  ;;  %v767_v8 = vld [vmem:[#allocation5 + $0xf0] sm:$0xff] }
 0x101   : > { %v603_v32 = vpop.f32.mrb[0].mxu1  ;;  %v2259_v17 = vsel %vm875_vm0, 1.0, %v2563_v7 }
 0x102   : > { %v604_v33 = vadd.f32 %v2242_v29, %v603_v32  ;;  %v2381_v34 = vpop.f32.mrb[1].mxu1  ;;  %v966_v25 = vpack.c.bf16 %v2260_v18, %v2259_v17 }
 0x103   : > { %v606_v35 = vpop.f32.mrb[2].mxu1  ;;  %v807_v51 = vpop.permute.xlu0 %806  ;;  %v755_v34 = vld [vmem:[#allocation5 + $0x90] sm:$0xff] }
 0x104   : > { %610 = vst.msk [vmem:[#allocation4] sm:$0xff] %vm565_vm3, %v604_v33  ;;  %v607_v36 = vadd.f32 %v2242_v29, %v606_v35  ;;  %v2382_v37 = vpop.f32.mrb[3].mxu1  ;;  %1260 = vperm.xlu1 %2498, %v719_v38   ;;  %vm877_vm2 = vcmp.eq.s32.totalorder %v807_v51, %v749_v12  ;;  %v840_v29 = vpop.permute.xlu1 %839  ;;  %v2266_v33 = vsel %vm882_vm9, 1.0, %v2563_v7  ;;  %v756_v35 = vld [vmem:[#allocation5 + $0x98] sm:$0xff]  ;;  %v762_v51 = vld [vmem:[#allocation5 + $0xc8] sm:$0xff] }
 0x105   : > { %v2261_v20 = vsel %vm877_vm2, 1.0, %v2563_v7  ;;  %vm888_vm15 = vcmp.eq.s32.totalorder %v840_v29, %v760_v47 }
 0x106   : > { %611 = vst.msk [vmem:[#allocation4 + $0x8] sm:$0xff] %vm565_vm3, %v607_v36  ;;  %v967_v27 = vpack.c.bf16 %v2262_v21, %v2261_v20  ;;  %v757_v36 = vld [vmem:[#allocation5 + $0xa0] sm:$0xff] }
 0x108   : > { %1265 = vperm.xlu1 %2498, %v720_v22   ;;  %v751_v22 = vld [vmem:[#allocation5 + $0x70] sm:$0xff] }
 0x109   : > { %v662_v41 = vpop.f32.mrb[4].mxu1 }
 0x10a   : > { %v2389_v42 = vpop.f32.mrb[5].mxu1 }
 0x10b   : > { %v665_v43 = vpop.f32.mrb[6].mxu1 }
 0x10c   : > { %v669_v44 = vpack.c.bf16 %v665_v43, %v662_v41  ;;  %v2390_v45 = vpop.f32.mrb[7].mxu1  ;;  %2500 = vset.pattern.permute.xlu1 %v2566_v53  ;;  %v2254_v53 = vsel %vm870_vm11, 1.0, %v2563_v7  ;;  %v846_v41 = vpop.permute.xlu1 %845  ;;  %vm884_vm11 = vcmp.eq.s32.totalorder %v828_v10, %v756_v35 }
 0x10d   : > { %1665 = vperm.xlu1 %2500, %v2881_v61   ;;  %v813_v61 = vpop.permute.xlu0 %812  ;;  %v963_v0 = vpack.c.bf16 %v2254_v53, %v2253_v57  ;;  %v2268_v43 = vsel %vm884_vm11, 1.0, %v2563_v7  ;;  %v2270_v45 = vsel %vm886_vm13, 1.0, %v2563_v7  ;;  %vm890_vm1 = vcmp.eq.s32.totalorder %v846_v41, %v762_v51 }
 0x10e   : > { %671 = vst.msk [vmem:[#allocation3] sm:$0xff] %vm670_vm7, %v669_v44  ;;  %vm879_vm5 = vcmp.eq.s32.totalorder %v813_v61, %v751_v22  ;;  %vm880_vm7 = vcmp.eq.s32.totalorder %v2972_v52, %v752_v23  ;;  %v2274_v58 = vsel %vm890_vm1, 1.0, %v2563_v7  ;;  %v765_v61 = vld [vmem:[#allocation5 + $0xe0] sm:$0xff] }
 0x10f   : > { %v2263_v30 = vsel %vm879_vm5, 1.0, %v2563_v7  ;;  %v2264_v31 = vsel %vm880_vm7, 1.0, %v2563_v7 }
 0x110   : > { %v852_v48 = vpop.permute.xlu1 %851 }
 0x111   : > { %1597 = vperm.xlu1 %2500, %v719_v38   ;;  %v819_v5 = vpop.permute.xlu0 %818  ;;  %v968_v38 = vpack.c.bf16 %v2264_v31, %v2263_v30  ;;  %vm892_vm4 = vcmp.eq.s32.totalorder %v852_v48, %v764_v60 }
 0x112   : > { %vm881_vm8 = vcmp.eq.s32.totalorder %v819_v5, %v753_v24  ;;  %v2276_v4 = vsel %vm892_vm4, 1.0, %v2563_v7 }
 0x113   : > { %v2265_v32 = vsel %vm881_vm8, 1.0, %v2563_v7 }
 0x114   : > { %v969_v40 = vpack.c.bf16 %v2266_v33, %v2265_v32  ;;  %v858_v57 = vpop.permute.xlu1 %857 }
 0x115   : > { %v977_v56 = vld [vmem:[#allocation3] sm:$0xff]  ;;  %v825_v16 = vpop.permute.xlu0 %824  ;;  %vm894_vm7 = vcmp.eq.s32.totalorder %v858_v57, %v766_v63 }
 0x116   : > { %2391 = vmatprep.subr.bf16.mxu0 %v977_v56  ;;  %vm883_vm10 = vcmp.eq.s32.totalorder %v825_v16, %v755_v34  ;;  %v2278_v6 = vsel %vm894_vm7, 1.0, %v2563_v7 }
 0x117   : > { %2392 = vmatpush3.bf16.msra.mxu0 %v977_v56  ;;  %v2267_v42 = vsel %vm883_vm10, 1.0, %v2563_v7  ;;  %v2272_v56 = vsel %vm888_vm15, 1.0, %v2563_v7 }
 0x118   : > { %v970_v50 = vpack.c.bf16 %v2268_v43, %v2267_v42  ;;  %v864_v2 = vpop.permute.xlu1 %863 }
 0x119   : > { %v831_v28 = vpop.permute.xlu0 %830  ;;  %vm896_vm9 = vcmp.eq.s32.totalorder %v864_v2, %v768_v9 }
 0x11a   : > { %2394 = vmatmul.mubr.msk.bf16.vlgmr.msra.gmra.mrb[0].mxu0 %vm978_vm6, %v962_v62  ;;  %vm885_vm12 = vcmp.eq.s32.totalorder %v831_v28, %v757_v36  ;;  %v2280_v16 = vsel %vm896_vm9, 1.0, %v2563_v7 }
 0x11b   : > { %2397 = vmatprep.mubr.msk.bf16.mxu0 %vm978_vm6, %v963_v0  ;;  %v2269_v11 = vsel %vm885_vm12, 1.0, %v2563_v7 }
 0x11c   : > { %v971_v52 = vpack.c.bf16 %v2270_v45, %v2269_v11  ;;  %v3018_v14 = vpop.permute.xlu1 %1270 }
 0x11d   : > { %v837_v37 = vpop.permute.xlu0 %836 }
 0x11e   : > { %vm887_vm14 = vcmp.eq.s32.totalorder %v837_v37, %v759_v46 }
 0x11f   : > { %v2271_v55 = vsel %vm887_vm14, 1.0, %v2563_v7 }
 0x120   : > { %v972_v62 = vpack.c.bf16 %v2272_v56, %v2271_v55  ;;  %v3024_v17 = vpop.permute.xlu1 %1195 }
 0x121   : > { %v843_v44 = vpop.permute.xlu0 %842 }
 0x122   : > { %2398 = vmatmul.mubr.msk.bf16.gmra.mrb[4].mxu0 %vm978_vm6, %v964_v13  ;;  %vm889_vm0 = vcmp.eq.s32.totalorder %v843_v44, %v761_v49 }
 0x123   : > { %2401 = vmatprep.mubr.msk.bf16.mxu0 %vm978_vm6, %v965_v15  ;;  %v2273_v53 = vsel %vm889_vm0, 1.0, %v2563_v7 }
 0x124   : > { %v973_v0 = vpack.c.bf16 %v2274_v58, %v2273_v53  ;;  %v3027_v19 = vpop.permute.xlu1 %1609 }
 0x125   : > { %v849_v54 = vpop.permute.xlu0 %848 }
 0x126   : > { %vm891_vm2 = vcmp.eq.s32.totalorder %v849_v54, %v763_v59 }
 0x127   : > { %v2275_v3 = vsel %vm891_vm2, 1.0, %v2563_v7 }
 0x128   : > { %v974_v10 = vpack.c.bf16 %v2276_v4, %v2275_v3  ;;  %v3029_v20 = vpop.permute.xlu1 %1541 }
 0x129   : > { %v855_v1 = vpop.permute.xlu0 %854 }
 0x12a   : > { %2402 = vmatmul.mubr.msk.bf16.gmra.mrb[8].mxu0 %vm978_vm6, %v966_v25  ;;  %vm893_vm5 = vcmp.eq.s32.totalorder %v855_v1, %v765_v61 }
 0x12b   : > { %2405 = vmatprep.mubr.msk.bf16.mxu0 %vm978_vm6, %v967_v27  ;;  %v2277_v5 = vsel %vm893_vm5, 1.0, %v2563_v7 }
 0x12c   : > { %v975_v13 = vpack.c.bf16 %v2278_v6, %v2277_v5  ;;  %v3031_v21 = vpop.permute.xlu1 %1280 }
 0x12d   : > { %v861_v12 = vpop.permute.xlu0 %860 }
 0x12e   : > { %vm895_vm8 = vcmp.eq.s32.totalorder %v861_v12, %v767_v8 }
 0x12f   : > { %v2279_v15 = vsel %vm895_vm8, 1.0, %v2563_v7 }
 0x130   : > { %v976_v18 = vpack.c.bf16 %v2280_v16, %v2279_v15  ;;  %v1201_v22 = vpop.permute.xlu1 %1200 }
 0x131   : > { %v1191_v31 = vpop.permute.xlu0 %1190 }
 0x132   : > { %2406 = vmatmul.mubr.msk.bf16.gmra.mrb[12].mxu0 %vm978_vm6, %v968_v38 }
 0x133   : > { %2409 = vmatprep.mubr.msk.bf16.mxu0 %vm978_vm6, %v969_v40 }
 0x134   : > { %v1206_v23 = vpop.permute.xlu1 %1205 }
 0x135   : > { %v3047_v33 = vpop.permute.xlu0 %1275 }
 0x138   : > { %v3033_v24 = vpop.permute.xlu1 %1617 }
 0x139   : > { %v3049_v35 = vpop.permute.xlu0 %1285 }
 0x13a   : > { %2410 = vmatmul.mubr.msk.bf16.gmra.mrb[16].mxu0 %vm978_vm6, %v970_v50 }
 0x13b   : > { %2413 = vmatprep.mubr.msk.bf16.mxu0 %vm978_vm6, %v971_v52 }
 0x13c   : > { %v1550_v25 = vpop.permute.xlu1 %1549 }
 0x13d   : > { %v3053_v37 = vpop.permute.xlu0 %1295 }
 0x140   : > { %v3035_v26 = vpop.permute.xlu1 %1290 }
 0x141   : > { %v3055_v39 = vpop.permute.xlu0 %1305 }
 0x142   : > { %2414 = vmatmul.mubr.msk.bf16.gmra.mrb[20].mxu0 %vm978_vm6, %v972_v62 }
 0x143   : > { %2417 = vmatprep.mubr.msk.bf16.mxu0 %vm978_vm6, %v973_v0 }
 0x144   : > { %v3037_v27 = vpop.permute.xlu1 %1210 }
 0x145   : > { %v3059_v41 = vpop.permute.xlu0 %1315 }
 0x148   : > { %v3039_v7 = vpop.permute.xlu1 %1215 }
 0x149   : > { %v3063_v43 = vpop.permute.xlu0 %1325 }
 0x14a   : > { %2418 = vmatmul.mubr.msk.bf16.gmra.mrb[24].mxu0 %vm978_vm6, %v974_v10 }
 0x14b   : > { %2421 = vmatprep.mubr.msk.bf16.mxu0 %vm978_vm6, %v975_v13 }
 0x14c   : > { %v3041_v28 = vpop.permute.xlu1 %1625 }
 0x14d   : > { %v3067_v44 = vpop.permute.xlu0 %1335 }
 0x150   : > { %v3043_v29 = vpop.permute.xlu1 %1557 }
 0x151   : > { %v3071_v46 = vpop.permute.xlu0 %1345 }
 0x152   : > { %2422 = vmatmul.mubr.msk.bf16.gmra.mrb[28].mxu0 %vm978_vm6, %v976_v18 }
 0x154   : > { %v3045_v30 = vpop.permute.xlu1 %1300 }
 0x155   : > { %v3073_v47 = vpop.permute.xlu0 %1605 }
 0x158   : > { %v1221_v32 = vpop.permute.xlu1 %1220 }
 0x159   : > { %v1546_v49 = vpop.permute.xlu0 %1545 }
 0x15c   : > { %v1226_v34 = vpop.permute.xlu1 %1225 }
 0x15d   : > { %v3079_v51 = vpop.permute.xlu0 %1613 }
 0x160   : > { %v3051_v36 = vpop.permute.xlu1 %1633 }
 0x161   : > { %v1554_v54 = vpop.permute.xlu0 %1553 }
 0x164   : > { %v1566_v38 = vpop.permute.xlu1 %1565 }
 0x165   : > { %v3085_v56 = vpop.permute.xlu0 %1621 }
 0x168   : > { %v3057_v40 = vpop.permute.xlu1 %1310 }
 0x169   : > { %v1562_v58 = vpop.permute.xlu0 %1561 }
 0x16c   : > { %v3061_v42 = vpop.permute.xlu1 %1230 }
 0x16d   : > { %v3104_v2 = vpop.permute.xlu0 %1629 }
 0x170   : > { %v3065_v11 = vpop.permute.xlu1 %1235 }
 0x171   : > { %v1570_v13 = vpop.permute.xlu0 %1569 }
 0x174   : > { %v3069_v45 = vpop.permute.xlu1 %1641 }
 0x178   : > { %v3075_v48 = vpop.permute.xlu1 %1573 }
 0x17c   : > { %v3077_v50 = vpop.permute.xlu1 %1320 }
 0x180   : > { %v3081_v52 = vpop.permute.xlu1 %1240 }
 0x184   : > { %v3083_v55 = vpop.permute.xlu1 %1245 }
 0x188   : > { %v3087_v57 = vpop.permute.xlu1 %1649 }
 0x18c   : > { %v3094_v61 = vpop.permute.xlu1 %1581 }
 0x190   : > { %v3108_v4 = vpop.permute.xlu1 %1330 }
 0x194   : > { %v3126_v16 = vpop.permute.xlu1 %1250 }
 0x1ed   : > { %v3089_v53 = vpop.f32.mrb[0].mxu0 }
 0x1ee   : > { %v1350_v59 = vmul.f32 %v3089_v53, %v1201_v22  ;;  %v3092_v60 = vpop.f32.mrb[1].mxu0  ;;  %v1670_v1 = vmul.f32 %v3089_v53, %v1550_v25 }
 0x1ef   : > { %v3096_v62 = vpop.f32.mrb[2].mxu0  ;;  %v1348_v6 = vmul.f32 %v1191_v31, %v3092_v60  ;;  %v1668_v15 = vmul.f32 %v3029_v20, %v3092_v60  ;;  %v3138_v31 = vpop.permute.xlu0 %1637 }
 0x1f0   : > { %v1351_v63 = vmul.f32 %v3096_v62, %v1206_v23  ;;  %1416 = vrot.lane.b32.xlu1 %v1350_v59, %s2567_s22  ;;  %v3100_v0 = vpop.f32.mrb[3].mxu0  ;;  %v1671_v3 = vmul.f32 %v3096_v62, %v1554_v54 }
 0x1f1   : > { %v1349_v10 = vmul.f32 %v3024_v17, %v3100_v0  ;;  %v1669_v18 = vmul.f32 %v1546_v49, %v3100_v0  ;;  %v1256_v49 = vpop.permute.xlu1 %1255 }
 0x1f2   : > { %1418 = vrot.lane.b32.xlu0 %v1351_v63, %s2567_s22 }
 0x1f4   : > { %1736 = vrot.lane.b32.xlu1 %v1670_v1, %s2568_s26  ;;  %v1578_v1 = vpop.permute.xlu0 %1577 }
 0x1f5   : > { %v3110_v5 = vpop.f32.mrb[4].mxu0 }
 0x1f6   : > { %1738 = vrot.lane.b32.xlu0 %v1671_v3, %s2568_s26  ;;  %v3114_v8 = vpop.f32.mrb[5].mxu0  ;;  %v1354_v17 = vmul.f32 %v3110_v5, %v1221_v32  ;;  %v1674_v59 = vmul.f32 %v3110_v5, %v1566_v38 }
 0x1f7   : > { %3530 = vst [vmem:[#allocation10_spill] sm:$0xff] %v3114_v8  ;;  %v3116_v9 = vpop.f32.mrb[6].mxu0  ;;  %v1352_v3 = vmul.f32 %v3037_v27, %v3114_v8 }
 0x1f8   : > { %1412 = vrot.lane.b32.xlu1 %v1348_v6, %s2567_s22  ;;  %v3121_v12 = vpop.f32.mrb[7].mxu0  ;;  %v1355_v20 = vmul.f32 %v3116_v9, %v1226_v34  ;;  %v1675_v32 = vmul.f32 %v3116_v9, %v1570_v13  ;;  %v3155_v6 = vpop.permute.xlu1 %1657 }
 0x1f9   : > { %3531 = vst [vmem:[#allocation11_spill] sm:$0xff] %v3121_v12  ;;  %v1353_v38 = vmul.f32 %v3039_v7, %v3121_v12  ;;  %v3167_v27 = vpop.permute.xlu0 %1645 }
 0x1fa   : > { %1414 = vrot.lane.b32.xlu0 %v1349_v10, %s2567_s22 }
 0x1fc   : > { %1732 = vrot.lane.b32.xlu1 %v1668_v15, %s2568_s26  ;;  %v1672_v15 = vmul.f32 %v3043_v29, %v3114_v8 }
 0x1fd   : > { %v3130_v22 = vpop.f32.mrb[8].mxu0 }
 0x1fe   : > { %3532 = vst [vmem:[#allocation12_spill] sm:$0xff] %v3130_v22  ;;  %1734 = vrot.lane.b32.xlu0 %v1669_v18, %s2568_s26  ;;  %v3134_v23 = vpop.f32.mrb[9].mxu0  ;;  %v1673_v18 = vmul.f32 %v1562_v58, %v3121_v12  ;;  %v1358_v7 = vmul.f32 %v3130_v22, %v3081_v52 }
 0x1ff   : > { %3533 = vst [vmem:[#allocation13_spill] sm:$0xff] %v3134_v23  ;;  %v3136_v25 = vpop.f32.mrb[10].mxu0 }
 0x200   : > { %3534 = vst [vmem:[#allocation14_spill] sm:$0xff] %v3136_v25  ;;  %1424 = vrot.lane.b32.xlu1 %v1354_v17, %s2567_s22  ;;  %v3142_v54 = vpop.f32.mrb[11].mxu0  ;;  %v1590_v17 = vpop.permute.xlu1 %1589  ;;  %v1359_v29 = vmul.f32 %v3136_v25, %v3083_v55  ;;  %v1356_v55 = vmul.f32 %v3061_v42, %v3134_v23 }
 0x201   : > { %3535 = vst [vmem:[#allocation15_spill] sm:$0xff] %v3142_v54  ;;  %v1677_v42 = vmul.f32 %v1578_v1, %v3142_v54 }
 0x202   : > { %1426 = vrot.lane.b32.xlu0 %v1355_v20, %s2567_s22 }
 0x204   : > { %1744 = vrot.lane.b32.xlu1 %v1674_v59, %s2568_s26  ;;  %v1341_v52 = vpop.permute.xlu1 %1340 }
 0x205   : > { %v3148_v63 = vpop.f32.mrb[12].mxu0 }
 0x206   : > { %1746 = vrot.lane.b32.xlu0 %v1675_v32, %s2568_s26  ;;  %v3153_v34 = vpop.f32.mrb[13].mxu0 }
 0x207   : > { %v3157_v10 = vpop.f32.mrb[14].mxu0 }
 0x208   : > { %1420 = vrot.lane.b32.xlu1 %v1352_v3, %s2567_s22  ;;  %v3162_v13 = vpop.f32.mrb[15].mxu0  ;;  %v1678_v3 = vmul.f32 %v3130_v22, %v3094_v61  ;;  %v1357_v61 = vmul.f32 %v3065_v11, %v3142_v54 }
 0x20a   : > { %1422 = vrot.lane.b32.xlu0 %v1353_v38, %s2567_s22  ;;  %v1586_v38 = vpop.permute.xlu0 %1585 }
 0x20c   : > { %1740 = vrot.lane.b32.xlu1 %v1672_v15, %s2568_s26  ;;  %v1679_v15 = vmul.f32 %v3136_v25, %v1586_v38  ;;  %v1261_v38 = vpop.permute.xlu1 %1260 }
 0x20d   : > { %v3171_v20 = vpop.f32.mrb[16].mxu0  ;;  %v1362_v25 = vmul.f32 %v3148_v63, %v1261_v38  ;;  %v1361_v38 = vmul.f32 %v1256_v49, %v3162_v13 }
 0x20e   : > { %1742 = vrot.lane.b32.xlu0 %v1673_v18, %s2568_s26  ;;  %v3176_v59 = vpop.f32.mrb[17].mxu0  ;;  %v3221_v1 = vpop.permute.xlu0 %1653  ;;  %v1366_v49 = vmul.f32 %v3171_v20, %v3031_v21 }
 0x20f   : > { %v3178_v32 = vpop.f32.mrb[18].mxu0  ;;  %v1364_v21 = vmul.f32 %v3018_v14, %v3176_v59 }
 0x210   : > { %1432 = vrot.lane.b32.xlu1 %v1358_v7, %s2567_s22  ;;  %v3183_v58 = vpop.f32.mrb[19].mxu0 }
 0x212   : > { %1434 = vrot.lane.b32.xlu0 %v1359_v29, %s2567_s22  ;;  %v1594_v54 = vpop.permute.xlu0 %1593 }
 0x214   : > { %1752 = vrot.lane.b32.xlu1 %v1678_v3, %s2568_s26  ;;  %v1676_v3 = vmul.f32 %v3075_v48, %v3134_v23 }
 0x215   : > { %v3190_v18 = vpop.f32.mrb[20].mxu0 }
 0x216   : > { %1754 = vrot.lane.b32.xlu0 %v1679_v15, %s2568_s26  ;;  %v3195_v7 = vpop.f32.mrb[21].mxu0  ;;  %v1370_v14 = vmul.f32 %v3190_v18, %v3045_v30 }
 0x217   : > { %v3197_v12 = vpop.f32.mrb[22].mxu0  ;;  %v1368_v30 = vmul.f32 %v3035_v26, %v3195_v7 }
 0x218   : > { %1428 = vrot.lane.b32.xlu1 %v1356_v55, %s2567_s22  ;;  %v3202_v29 = vpop.f32.mrb[23].mxu0  ;;  %v1266_v55 = vpop.permute.xlu1 %1265 }
 0x219   : > { %v1363_v8 = vmul.f32 %v3157_v10, %v1266_v55 }
 0x21a   : > { %1430 = vrot.lane.b32.xlu0 %v1357_v61, %s2567_s22  ;;  %v1360_v61 = vmul.f32 %v3126_v16, %v3153_v34  ;;  %v1681_v16 = vmul.f32 %v1594_v54, %v3162_v13  ;;  %v1687_v54 = vmul.f32 %v3178_v32, %v3033_v24  ;;  %v1685_v24 = vmul.f32 %v3027_v19, %v3183_v58 }
 0x21b   : > { %v1691_v19 = vmul.f32 %v3197_v12, %v3051_v36  ;;  %v1689_v36 = vmul.f32 %v3041_v28, %v3202_v29 }
 0x21c   : > { %1748 = vrot.lane.b32.xlu1 %v1676_v3, %s2568_s26 }
 0x21d   : > { %v3209_v15 = vpop.f32.mrb[24].mxu0 }
 0x21e   : > { %1750 = vrot.lane.b32.xlu0 %v1677_v42, %s2568_s26  ;;  %v3213_v11 = vpop.f32.mrb[25].mxu0  ;;  %v1680_v42 = vmul.f32 %v1590_v17, %v3153_v34  ;;  %v1367_v17 = vmul.f32 %v3178_v32, %v3049_v35  ;;  %v1365_v35 = vmul.f32 %v3047_v33, %v3183_v58  ;;  %v1371_v33 = vmul.f32 %v3197_v12, %v3055_v39 }
 0x21f   : > { %v3215_v22 = vpop.f32.mrb[26].mxu0  ;;  %v1369_v39 = vmul.f32 %v3053_v37, %v3202_v29  ;;  %v1374_v26 = vmul.f32 %v3209_v15, %v3077_v50  ;;  %v1372_v50 = vmul.f32 %v3057_v40, %v3213_v11 }
 0x220   : > { %1440 = vrot.lane.b32.xlu1 %v1362_v25, %s2567_s22  ;;  %v3219_v48 = vpop.f32.mrb[27].mxu0  ;;  %v1375_v37 = vmul.f32 %v3215_v22, %v3063_v43  ;;  %v1695_v28 = vmul.f32 %v3215_v22, %v3087_v57 }
 0x221   : > { %v1373_v43 = vmul.f32 %v3059_v41, %v3219_v48  ;;  %v1693_v57 = vmul.f32 %v3069_v45, %v3219_v48  ;;  %v1864_v41 = vlaneseq }
 0x222   : > { %1442 = vrot.lane.b32.xlu0 %v1363_v8, %s2567_s22 }
 0x224   : > { %1436 = vrot.lane.b32.xlu1 %v1360_v61, %s2567_s22  ;;  %v1666_v61 = vpop.permute.xlu1 %1665 }
 0x225   : > { %v3228_v3 = vpop.f32.mrb[28].mxu0 }
 0x226   : > { %v1378_v55 = vmul.f32 %v3228_v3, %v1341_v52  ;;  %1438 = vrot.lane.b32.xlu0 %v1361_v38, %s2567_s22  ;;  %v3233_v25 = vpop.f32.mrb[29].mxu0  ;;  %v1686_v52 = vmul.f32 %v3171_v20, %v3079_v51  ;;  %v1684_v51 = vmul.f32 %v3073_v47, %v3176_v59  ;;  %v1690_v47 = vmul.f32 %v3190_v18, %v3104_v2  ;;  %v1662_v38 = vpop.permute.xlu0 %1661 }
 0x227   : > { %v3235_v23 = vpop.f32.mrb[30].mxu0  ;;  %v1688_v2 = vmul.f32 %v3085_v56, %v3195_v7  ;;  %v1694_v56 = vmul.f32 %v3209_v15, %v3167_v27  ;;  %v1692_v27 = vmul.f32 %v3138_v31, %v3213_v11  ;;  %v1376_v31 = vmul.f32 %v3108_v4, %v3233_v25  ;;  %v704_v4 = vld [vmem:[%s3513_s1] sm:$0x3] }
 0x228   : > { %1756 = vrot.lane.b32.xlu1 %v1680_v42, %s2568_s26  ;;  %v3239_v8 = vpop.f32.mrb[31].mxu0  ;;  %v1379_v40 = vmul.f32 %v3235_v23, %v3071_v46  ;;  %v1598_v42 = vpop.permute.xlu1 %1597  ;;  %v1696_v46 = vmul.f32 %v3221_v1, %v3233_v25 }
 0x229   : > { %v1377_v45 = vmul.f32 %v3067_v44, %v3239_v8  ;;  %v1697_v44 = vmul.f32 %v3155_v6, %v3239_v8  ;;  %v2569_v6 = vmov 1.0|1.0  }
 0x22a   : > { %1758 = vrot.lane.b32.xlu0 %v1681_v16, %s2568_s26  ;;  %v1865_v16 = vshrl.u32 %v1864_v41, 7 }
 0x22c   : > { %1448 = vrot.lane.b32.xlu1 %v1366_v49, %s2567_s22  ;;  %v1602_v49 = vpop.permute.xlu0 %1601 }
 0x22e   : > { %1450 = vrot.lane.b32.xlu0 %v1367_v17, %s2567_s22  ;;  %v1870_v17 = vsub.s32 1, %v1865_v16 }
 0x230   : > { %1768 = vrot.lane.b32.xlu1 %v1686_v52, %s2568_s26 }
 0x232   : > { %1770 = vrot.lane.b32.xlu0 %v1687_v54, %s2568_s26 }
 0x234   : > { %1444 = vrot.lane.b32.xlu1 %v1364_v21, %s2567_s22  ;;  %v1871_v21 = vrot.slane %v704_v4, %v1870_v17 }
 0x236   : > { %1446 = vrot.lane.b32.xlu0 %v1365_v35, %s2567_s22 }
 0x238   : > { %1764 = vrot.lane.b32.xlu1 %v1684_v51, %s2568_s26  ;;  %v1861_v51 = vld [vmem:[#allocation6 + $0x8] sm:$0xff] }
 0x239   : > { %vm1873_vm6 = vcmp.eq.s32.totalorder %v1861_v51, %v1871_v21  ;;  %v3538_v51 = vld [vmem:[#allocation12_spill] sm:$0xff] }
 0x23a   : > { %1766 = vrot.lane.b32.xlu0 %v1685_v24, %s2568_s26  ;;  %v1863_v24 = vld [vmem:[#allocation6 + $0x18] sm:$0xff] }
 0x23b   : > { %vm1875_vm10 = vcmp.eq.s32.totalorder %v1863_v24, %v1871_v21 }
 0x23c   : > { %1456 = vrot.lane.b32.xlu1 %v1370_v14, %s2567_s22  ;;  %vm2301_vm11 = vmpackc.low %vm1875_vm10, %vm1873_vm6 }
 0x23d   : > { %2302 = vmatprep.mubr.msk.bf16.mxu1 %vm2301_vm11, %v2569_v6 }
 0x23e   : > { %1458 = vrot.lane.b32.xlu0 %v1371_v33, %s2567_s22  ;;  %v1698_v33 = vmul.f32 %v3228_v3, %v1662_v38 }
 0x240   : > { %1776 = vrot.lane.b32.xlu1 %v1690_v47, %s2568_s26 }
 0x242   : > { %1778 = vrot.lane.b32.xlu0 %v1691_v19, %s2568_s26  ;;  %v1699_v19 = vmul.f32 %v3235_v23, %v1666_v61 }
 0x244   : > { %1452 = vrot.lane.b32.xlu1 %v1368_v30, %s2567_s22 }
 0x246   : > { %1454 = vrot.lane.b32.xlu0 %v1369_v39, %s2567_s22 }
 0x248   : > { %1772 = vrot.lane.b32.xlu1 %v1688_v2, %s2568_s26 }
 0x24a   : > { %1774 = vrot.lane.b32.xlu0 %v1689_v36, %s2568_s26 }
 0x24c   : > { %1464 = vrot.lane.b32.xlu1 %v1374_v26, %s2567_s22  ;;  %v1683_v26 = vmul.f32 %v3157_v10, %v1602_v49 }
 0x24e   : > { %1466 = vrot.lane.b32.xlu0 %v1375_v37, %s2567_s22 }
 0x250   : > { %1784 = vrot.lane.b32.xlu1 %v1694_v56, %s2568_s26 }
 0x252   : > { %1786 = vrot.lane.b32.xlu0 %v1695_v28, %s2568_s26 }
 0x254   : > { %1460 = vrot.lane.b32.xlu1 %v1372_v50, %s2567_s22 }
 0x256   : > { %1462 = vrot.lane.b32.xlu0 %v1373_v43, %s2567_s22 }
 0x258   : > { %1780 = vrot.lane.b32.xlu1 %v1692_v27, %s2568_s26 }
 0x25a   : > { %1782 = vrot.lane.b32.xlu0 %v1693_v57, %s2568_s26 }
 0x25c   : > { %1472 = vrot.lane.b32.xlu1 %v1378_v55, %s2567_s22  ;;  %v1866_v55 = vsub.s32 0, %v1865_v16 }
 0x25e   : > { %1474 = vrot.lane.b32.xlu0 %v1379_v40, %s2567_s22  ;;  %v3333_v1 = vrot.slane %v704_v4, %v1866_v55  ;;  %v3537_v55 = vld [vmem:[#allocation11_spill] sm:$0xff] }
 0x260   : > { %1468 = vrot.lane.b32.xlu1 %v1376_v31, %s2567_s22 }
 0x262   : > { %v1417_v52 = vpop.permute.xlu1 %1416  ;;  %1470 = vrot.lane.b32.xlu0 %v1377_v45, %s2567_s22 }
 0x263   : > { %v1510_v54 = vadd.f32 %v3089_v53, %v1417_v52  ;;  %v3536_v52 = vld [vmem:[#allocation10_spill] sm:$0xff] }
 0x264   : > { %v1419_v35 = vpop.permute.xlu0 %1418  ;;  %1788 = vrot.lane.b32.xlu1 %v1696_v46, %s2568_s26 }
 0x265   : > { %v1511_v14 = vadd.f32 %v3096_v62, %v1419_v35  ;;  %v1682_v62 = vmul.f32 %v3148_v63, %v1598_v42 }
 0x266   : > { %v1737_v47 = vpop.permute.xlu1 %1736  ;;  %1790 = vrot.lane.b32.xlu0 %v1697_v44, %s2568_s26 }
 0x267   : > { %v3338_v53 = vadd.f32 %v1737_v47, %v1510_v54 }
 0x268   : > { %v1739_v30 = vpop.permute.xlu0 %1738  ;;  %1792 = vrot.lane.b32.xlu1 %v1698_v33, %s2568_s26  ;;  %v3539_v33 = vld [vmem:[#allocation14_spill] sm:$0xff] }
 0x269   : > { %v3343_v39 = vadd.f32 %v1739_v30, %v1511_v14 }
 0x26a   : > { %v1413_v2 = vpop.permute.xlu1 %1412  ;;  %1794 = vrot.lane.b32.xlu0 %v1699_v19, %s2568_s26 }
 0x26b   : > { %v1889_v36 = vpack.c.bf16 %v3343_v39, %v3338_v53  ;;  %v1508_v28 = vadd.f32 %v1413_v2, %v3092_v60 }
 0x26c   : > { %v1415_v37 = vpop.permute.xlu0 %1414  ;;  %1760 = vrot.lane.b32.xlu1 %v1682_v62, %s2568_s26 }
 0x26d   : > { %v1509_v50 = vadd.f32 %v1415_v37, %v3100_v0 }
 0x26e   : > { %v1733_v56 = vpop.permute.xlu1 %1732  ;;  %1762 = vrot.lane.b32.xlu0 %v1683_v26, %s2568_s26 }
 0x26f   : > { %v3354_v27 = vadd.f32 %v1733_v56, %v1508_v28 }
 0x270   : > { %v1735_v43 = vpop.permute.xlu0 %1734 }
 0x271   : > { %v3356_v61 = vadd.f32 %v1735_v43, %v1509_v50  ;;  %v3540_v50 = vld [vmem:[#allocation13_spill] sm:$0xff] }
 0x272   : > { %v1425_v57 = vpop.permute.xlu1 %1424 }
 0x273   : > { %v1888_v38 = vpack.c.bf16 %v3356_v61, %v3354_v27  ;;  %v1514_v40 = vadd.f32 %v3110_v5, %v1425_v57  ;;  %v3541_v57 = vld [vmem:[#allocation15_spill] sm:$0xff] }
 0x274   : > { %v1427_v41 = vpop.permute.xlu0 %1426 }
 0x275   : > { %v1515_v42 = vadd.f32 %v3116_v9, %v1427_v41 }
 0x276   : > { %v1745_v31 = vpop.permute.xlu1 %1744 }
 0x277   : > { %v3362_v16 = vadd.f32 %v1745_v31, %v1514_v40 }
 0x278   : > { %v1747_v60 = vpop.permute.xlu0 %1746 }
 0x279   : > { %v3364_v49 = vadd.f32 %v1747_v60, %v1515_v42 }
 0x27a   : > { %v1421_v0 = vpop.permute.xlu1 %1420 }
 0x27b   : > { %v1891_v45 = vpack.c.bf16 %v3364_v49, %v3362_v16  ;;  %v1512_v4 = vadd.f32 %v1421_v0, %v3536_v52 }
 0x27c   : > { %v1423_v17 = vpop.permute.xlu0 %1422 }
 0x27d   : > { %v1513_v54 = vadd.f32 %v1423_v17, %v3537_v55 }
 0x27e   : > { %v1741_v46 = vpop.permute.xlu1 %1740 }
 0x27f   : > { %v3370_v21 = vadd.f32 %v1741_v46, %v1512_v4 }
 0x280   : > { %v1743_v5 = vpop.permute.xlu0 %1742 }
 0x281   : > { %v3372_v9 = vadd.f32 %v1743_v5, %v1513_v54 }
 0x282   : > { %v1433_v44 = vpop.permute.xlu1 %1432 }
 0x283   : > { %v1890_v35 = vpack.c.bf16 %v3372_v9, %v3370_v21  ;;  %v1518_v24 = vadd.f32 %v3538_v51, %v1433_v44 }
 0x284   : > { %v1435_v14 = vpop.permute.xlu0 %1434 }
 0x285   : > { %v1519_v47 = vadd.f32 %v3539_v33, %v1435_v14 }
 0x286   : > { %v1753_v19 = vpop.permute.xlu1 %1752 }
 0x287   : > { %v3378_v30 = vadd.f32 %v1753_v19, %v1518_v24 }
 0x288   : > { %v1755_v62 = vpop.permute.xlu0 %1754 }
 0x289   : > { %v3380_v2 = vadd.f32 %v1755_v62, %v1519_v47 }
 0x28a   : > { %v1429_v26 = vpop.permute.xlu1 %1428 }
 0x28b   : > { %v1893_v37 = vpack.c.bf16 %v3380_v2, %v3378_v30  ;;  %v1516_v43 = vadd.f32 %v1429_v26, %v3540_v50  ;;  %v1862_v2 = vld [vmem:[#allocation6 + $0x10] sm:$0xff] }
 0x28c   : > { %v1431_v56 = vpop.permute.xlu0 %1430  ;;  %vm1874_vm13 = vcmp.eq.s32.totalorder %v1862_v2, %v3333_v1 }
 0x28d   : > { %v1517_v40 = vadd.f32 %v1431_v56, %v3541_v57 }
 0x28e   : > { %v1749_v28 = vpop.permute.xlu1 %1748 }
 0x28f   : > { %v3386_v42 = vadd.f32 %v1749_v28, %v1516_v43 }
 0x290   : > { %v1751_v41 = vpop.permute.xlu0 %1750 }
 0x291   : > { %v3388_v31 = vadd.f32 %v1751_v41, %v1517_v40 }
 0x292   : > { %v1441_v60 = vpop.permute.xlu1 %1440 }
 0x293   : > { %v1892_v0 = vpack.c.bf16 %v3388_v31, %v3386_v42  ;;  %v3393_v17 = vadd.f32 %v3148_v63, %v1441_v60 }
 0x294   : > { %v1443_v46 = vpop.permute.xlu0 %1442 }
 0x295   : > { %v3396_v52 = vadd.f32 %v3157_v10, %v1443_v46 }
 0x296   : > { %v1437_v4 = vpop.permute.xlu1 %1436 }
 0x297   : > { %v1520_v5 = vadd.f32 %v1437_v4, %v3153_v34 }
 0x298   : > { %v1439_v55 = vpop.permute.xlu0 %1438 }
 0x299   : > { %v1521_v44 = vadd.f32 %v1439_v55, %v3162_v13 }
 0x29a   : > { %v1757_v54 = vpop.permute.xlu1 %1756 }
 0x29b   : > { %v3400_v24 = vadd.f32 %v1757_v54, %v1520_v5 }
 0x29c   : > { %v1759_v51 = vpop.permute.xlu0 %1758 }
 0x29d   : > { %v3402_v14 = vadd.f32 %v1759_v51, %v1521_v44 }
 0x29e   : > { %v1449_v33 = vpop.permute.xlu1 %1448 }
 0x29f   : > { %v1894_v63 = vpack.c.bf16 %v3402_v14, %v3400_v24  ;;  %v1526_v10 = vadd.f32 %v3171_v20, %v1449_v33 }
 0x2a0   : > { %v1451_v47 = vpop.permute.xlu0 %1450 }
 0x2a1   : > { %v1527_v62 = vadd.f32 %v3178_v32, %v1451_v47 }
 0x2a2   : > { %v1769_v19 = vpop.permute.xlu1 %1768 }
 0x2a3   : > { %v1846_v56 = vadd.f32 %v1769_v19, %v1526_v10 }
 0x2a4   : > { %v1771_v26 = vpop.permute.xlu0 %1770 }
 0x2a5   : > { %v1847_v34 = vadd.f32 %v1771_v26, %v1527_v62 }
 0x2a6   : > { %v1445_v28 = vpop.permute.xlu1 %1444 }
 0x2a7   : > { %v1897_v13 = vpack.c.bf16 %v1847_v34, %v1846_v56  ;;  %v1524_v57 = vadd.f32 %v1445_v28, %v3176_v59 }
 0x2a8   : > { %v1447_v50 = vpop.permute.xlu0 %1446 }
 0x2a9   : > { %v1525_v40 = vadd.f32 %v1447_v50, %v3183_v58 }
 0x2aa   : > { %v1765_v43 = vpop.permute.xlu1 %1764 }
 0x2ab   : > { %v1844_v60 = vadd.f32 %v1765_v43, %v1524_v57 }
 0x2ac   : > { %v1767_v41 = vpop.permute.xlu0 %1766 }
 0x2ad   : > { %v1845_v46 = vadd.f32 %v1767_v41, %v1525_v40 }
 0x2ae   : > { %v1457_v4 = vpop.permute.xlu1 %1456 }
 0x2af   : > { %v1896_v55 = vpack.c.bf16 %v1845_v46, %v1844_v60  ;;  %v1530_v32 = vadd.f32 %v3190_v18, %v1457_v4 }
 0x2b0   : > { %v1459_v54 = vpop.permute.xlu0 %1458 }
 0x2b1   : > { %2347 = vmatprep.subr.bf16.mxu1 %v1896_v55  ;;  %v1531_v5 = vadd.f32 %v3197_v12, %v1459_v54 }
 0x2b2   : > { %2348 = vmatpush3.bf16.msra.mxu1 %v1888_v38  ;;  %v1777_v20 = vpop.permute.xlu1 %1776 }
 0x2b3   : > { %2349 = vmatprep.subr.bf16.mxu1 %v1897_v13  ;;  %v1850_v44 = vadd.f32 %v1777_v20, %v1530_v32 }
 0x2b4   : > { %v1779_v59 = vpop.permute.xlu0 %1778 }
 0x2b5   : > { %v1851_v58 = vadd.f32 %v1779_v59, %v1531_v5  ;;  %v1886_v59 = vld [vmem:[#allocation4] sm:$0xff] }
 0x2b6   : > { %2350 = vmatpush3.bf16.msra.mxu1 %v1889_v36  ;;  %v1453_v51 = vpop.permute.xlu1 %1452 }
 0x2b7   : > { %v1899_v33 = vpack.c.bf16 %v1851_v58, %v1850_v44  ;;  %v1528_v27 = vadd.f32 %v1453_v51, %v3195_v7  ;;  %v1887_v51 = vld [vmem:[#allocation4 + $0x8] sm:$0xff] }
 0x2b8   : > { %v1455_v47 = vpop.permute.xlu0 %1454 }
 0x2b9   : > { %v1529_v61 = vadd.f32 %v1455_v47, %v3202_v29 }
 0x2ba   : > { %v1773_v19 = vpop.permute.xlu1 %1772 }
 0x2bb   : > { %v1848_v18 = vadd.f32 %v1773_v19, %v1528_v27 }
 0x2bc   : > { %v1775_v38 = vpop.permute.xlu0 %1774 }
 0x2bd   : > { %v1849_v10 = vadd.f32 %v1775_v38, %v1529_v61 }
 0x2be   : > { %v1465_v12 = vpop.permute.xlu1 %1464 }
 0x2bf   : > { %v1898_v62 = vpack.c.bf16 %v1849_v10, %v1848_v18  ;;  %v1534_v39 = vadd.f32 %v3209_v15, %v1465_v12 }
 0x2c0   : > { %v1467_v26 = vpop.permute.xlu0 %1466 }
 0x2c1   : > { %2351 = vmatprep.subr.bf16.mxu1 %v1898_v62  ;;  %v1535_v36 = vadd.f32 %v3215_v22, %v1467_v26 }
 0x2c2   : > { %2352 = vmatpush3.bf16.msra.mxu1 %v1890_v35  ;;  %v1785_v53 = vpop.permute.xlu1 %1784 }
 0x2c3   : > { %2353 = vmatprep.subr.bf16.mxu1 %v1899_v33  ;;  %v1854_v56 = vadd.f32 %v1785_v53, %v1534_v39 }
 0x2c4   : > { %v1787_v7 = vpop.permute.xlu0 %1786 }
 0x2c5   : > { %v1855_v29 = vadd.f32 %v1787_v7, %v1535_v36 }
 0x2c6   : > { %2354 = vmatpush3.bf16.msra.mxu1 %v1891_v45  ;;  %v1461_v34 = vpop.permute.xlu1 %1460 }
 0x2c7   : > { %v1901_v28 = vpack.c.bf16 %v1855_v29, %v1854_v56  ;;  %v1532_v21 = vadd.f32 %v1461_v34, %v3213_v11 }
 0x2c8   : > { %v1463_v13 = vpop.permute.xlu0 %1462 }
 0x2c9   : > { %v1533_v9 = vadd.f32 %v1463_v13, %v3219_v48 }
 0x2ca   : > { %v1781_v50 = vpop.permute.xlu1 %1780 }
 0x2cb   : > { %v1852_v15 = vadd.f32 %v1781_v50, %v1532_v21 }
 0x2cc   : > { %v1783_v35 = vpop.permute.xlu0 %1782 }
 0x2cd   : > { %v1853_v43 = vadd.f32 %v1783_v35, %v1533_v9 }
 0x2ce   : > { %v1473_v22 = vpop.permute.xlu1 %1472 }
 0x2cf   : > { %v1900_v57 = vpack.c.bf16 %v1853_v43, %v1852_v15  ;;  %v1538_v55 = vadd.f32 %v3228_v3, %v1473_v22 }
 0x2d0   : > { %v1475_v40 = vpop.permute.xlu0 %1474 }
 0x2d1   : > { %2355 = vmatprep.subr.bf16.mxu1 %v1900_v57  ;;  %v1539_v42 = vadd.f32 %v3235_v23, %v1475_v40 }
 0x2d2   : > { %2356 = vmatpush3.bf16.msra.mxu1 %v1892_v0  ;;  %v1469_v16 = vpop.permute.xlu1 %1468 }
 0x2d3   : > { %2357 = vmatprep.subr.bf16.mxu1 %v1901_v28  ;;  %v1536_v48 = vadd.f32 %v1469_v16, %v3233_v25 }
 0x2d4   : > { %v1471_v49 = vpop.permute.xlu0 %1470 }
 0x2d5   : > { %v1537_v45 = vadd.f32 %v1471_v49, %v3239_v8  ;;  %v1860_v8 = vld [vmem:[#allocation6] sm:$0xff] }
 0x2d6   : > { %2358 = vmatpush3.bf16.msra.mxu1 %v1893_v37  ;;  %v1789_v11 = vpop.permute.xlu1 %1788  ;;  %vm1872_vm12 = vcmp.eq.s32.totalorder %v1860_v8, %v3333_v1 }
 0x2d7   : > { %v1856_v60 = vadd.f32 %v1789_v11, %v1536_v48  ;;  %vm2303_vm14 = vmpackc.low %vm1874_vm13, %vm1872_vm12 }
 0x2d8   : > { %v1791_v41 = vpop.permute.xlu0 %1790 }
 0x2d9   : > { %v1857_v46 = vadd.f32 %v1791_v41, %v1537_v45 }
 0x2da   : > { %v1793_v4 = vpop.permute.xlu1 %1792 }
 0x2db   : > { %v1902_v31 = vpack.c.bf16 %v1857_v46, %v1856_v60  ;;  %v1858_v54 = vadd.f32 %v1793_v4, %v1538_v55 }
 0x2dc   : > { %v1795_v0 = vpop.permute.xlu0 %1794 }
 0x2dd   : > { %v1859_v20 = vadd.f32 %v1795_v0, %v1539_v42  ;;  %2359 = vmatprep.subr.bf16.mxu1 %v1902_v31 }
 0x2de   : > { %v1761_v30 = vpop.permute.xlu1 %1760  ;;  %2360 = vmatpush3.bf16.msra.mxu1 %v1894_v63 }
 0x2df   : > { %v1903_v25 = vpack.c.bf16 %v1859_v20, %v1858_v54  ;;  %v1842_v32 = vadd.f32 %v1761_v30, %v3393_v17 }
 0x2e0   : > { %v1763_v37 = vpop.permute.xlu0 %1762 }
 0x2e1   : > { %v1843_v3 = vadd.f32 %v1763_v37, %v3396_v52  ;;  %2361 = vmatprep.subr.bf16.mxu1 %v1903_v25 }
 0x2e3   : > { %v1895_v23 = vpack.c.bf16 %v1843_v3, %v1842_v32 }
 0x2e5   : > { %2362 = vmatpush3.bf16.msra.mxu1 %v1895_v23 }
 0x2e8   : > { %2304 = vmatmul.mubr.msk.bf16.vlgmr.msra.gmra.mrb[8].mxu1 %vm2303_vm14, %v2569_v6 }
 0x3bb   : > { %v2363_v24 = vpop.f32.mrb[8].mxu1 }
 0x3bc   : > { %v2364_v14 = vpop.f32.mrb[9].mxu1 }
 0x3bd   : > { %v2365_v63 = vadd.f32 %v2364_v14, %v2363_v24  ;;  %v2366_v5 = vpop.f32.mrb[10].mxu1  ;;  %1954 = sbr.rel (!%p469_p4) target bundleno = 974 (0x3ce), region = 76 }
 0x3be   : > { %v2367_v44 = vpop.f32.mrb[11].mxu1 }
 0x3bf   : > { %v1945_v58 = vadd.f32 %v2365_v63, %v1886_v59  ;;  %v2368_v17 = vadd.f32 %v2367_v44, %v2366_v5 }
 0x3c1   : > { %1948 = vst.msk [vmem:[#allocation4] sm:$0xff] %vm565_vm3, %v1945_v58  ;;  %v1946_v52 = vadd.f32 %v2368_v17, %v1887_v51 }
 0x3c3   : > { %1949 = vst.msk [vmem:[#allocation4 + $0x8] sm:$0xff] %vm565_vm3, %v1946_v52 }
 0x3c8   : > { %v1955_v1 = vld [vmem:[#allocation4] sm:$0xff] }
 0x3c9   : > { %v1957_v6 = vmax.f32 %v1955_v1, 0.0 }
 0x3ca   : > { %v1956_v33 = vld [vmem:[#allocation4 + $0x8] sm:$0xff] }
 0x3cb   : > { %v1958_v47 = vmax.f32 %v1956_v33, 0.0  ;;  %1959 = vst.msk [vmem:[#allocation2] sm:$0xff] %vm565_vm3, %v1957_v6 }
 0x3cd   : > { %1960 = vst.msk [vmem:[#allocation2 + $0x8] sm:$0xff] %vm565_vm3, %v1958_v47 }
 0x3ce PF: > { %p1961_p6 = scmp.eq.s32.totalorder %s2553_s17, 2 }
 0x3cf   : > { %v2505_v19 = vld [vmem:[%s3519_s7] sm:$0xff] (%p1961_p6)   ;;  %v2570_v27 = vmov (%p1961_p6), 0.0   ;;  %v2506_v61 = vld [vmem:[%s3519_s7 + $0x8] sm:$0xff] (%p1961_p6)   ;;  %vm2571_vm15 = vmmov (%p1961_p6), 0  }
 0x3d0   : > { %1965 = sbr.rel (!%p1961_p6) target bundleno = 1422 (0x58e), region = 80  ;;  %2425 = vmatprep.subr.bf16.mxu0 (%p1961_p6), %v2570_v27  ;;  %2433 = vmatprep.subr.bf16.mxu1 (%p1961_p6), %v2570_v27  ;;  %v2507_v26 = vld [vmem:[%s3521_s9] sm:$0xff] (%p1961_p6)   ;;  %v2508_v53 = vld [vmem:[%s3521_s9 + $0x8] sm:$0xff] (%p1961_p6)  }
 0x3d1   : > { %2426 = vmatpush3.bf16.msra.mxu0 (%p1961_p6), %v2505_v19  ;;  %2429 = vmatprep.mubr.msk.bf16.mxu0 (%p1961_p6), %vm2571_vm15, %v2570_v27  ;;  %v2307_v39 = vld [vmem:[%s3520_s8] ss:$0 sm:$0xff] (%p1961_p6) }
 0x3d2   : > { %v1966_v38 = vld [vmem:[#allocation4] sm:$0xff] (%p1961_p6)  ;;  %2427 = vmatprep.subr.bf16.mxu0 (%p1961_p6), %v2570_v27  ;;  %2437 = vmatprep.mubr.msk.bf16.mxu1 (%p1961_p6), %vm2571_vm15, %v2570_v27  ;;  %v2311_v9 = vld [vmem:[%s3522_s10] ss:$0 sm:$0xff] (%p1961_p6) }
 0x3d3   : > { %v1968_v10 = vmax.f32 (%p1961_p6), %v1966_v38, 0.0  ;;  %2434 = vmatpush3.bf16.msra.mxu1 (%p1961_p6), %v2507_v26 }
 0x3d4   : > { %v1967_v18 = vld [vmem:[#allocation4 + $0x8] sm:$0xff] (%p1961_p6)  ;;  %2435 = vmatprep.subr.bf16.mxu1 (%p1961_p6), %v2570_v27 }
 0x3d5   : > { %v1969_v12 = vmax.f32 (%p1961_p6), %v1967_v18, 0.0  ;;  %2428 = vmatpush3.bf16.msra.mxu0 (%p1961_p6), %v2506_v61 }
 0x3d7   : > { %v1970_v62 = vpack.c.bf16 %v1969_v12, %v1968_v10  ;;  %2436 = vmatpush3.bf16.msra.mxu1 %v2508_v53 }
 0x3d9   : > { %2430 = vmatmul.mubr.msk.bf16.vlgmr.msra.gmra.mrb[0].mxu0 %vm565_vm3, %v1970_v62 }
 0x4ac   : > { %v2031_v36 = vpop.f32.mrb[0].mxu0 }
 0x4ad   : > { %v2032_v7 = vadd.f32 %v2307_v39, %v2031_v36  ;;  %v2431_v56 = vpop.f32.mrb[1].mxu0 }
 0x4ae   : > { %v2034_v29 = vpop.f32.mrb[2].mxu0 }
 0x4af   : > { %v2035_v34 = vadd.f32 %v2307_v39, %v2034_v29  ;;  %v2432_v28 = vpop.f32.mrb[3].mxu0  ;;  %v2038_v13 = vmax.f32 %v2032_v7, 0.0 }
 0x4b1   : > { %v2039_v50 = vmax.f32 %v2035_v34, 0.0 }
 0x4b3   : > { %v2040_v21 = vpack.c.bf16 %v2039_v50, %v2038_v13 }
 0x4b5   : > { %2438 = vmatmul.mubr.msk.bf16.vlgmr.msra.gmra.mrb[0].mxu1 %vm565_vm3, %v2040_v21 }
 0x588   : > { %v2101_v35 = vpop.f32.mrb[0].mxu1 }
 0x589   : > { %v2102_v15 = vadd.f32 %v2311_v9, %v2101_v35  ;;  %v2439_v43 = vpop.f32.mrb[1].mxu1 }
 0x58a   : > { %v2104_v22 = vpop.f32.mrb[2].mxu1 }
 0x58b   : > { %2108 = vst [vmem:[#allocation7] sm:$0xff] %v2102_v15  ;;  %v2105_v57 = vadd.f32 %v2311_v9, %v2104_v22  ;;  %v2440_v40 = vpop.f32.mrb[3].mxu1 }
 0x58d   : > { %2109 = vst [vmem:[#allocation7 + $0x8] sm:$0xff] %v2105_v57 }
 0x58e PF: > { %s3542_s22 = sadd.s32 4294967295, %s2561_s19   ;;  %s2572_s23 = smov [#allocation7]  }
 0x58f   : > { %p3477_p7 = scmp.eq.s32.totalorder %s3542_s22, 2  ;;  %s2116_s29 = sshll.u32 %s2572_s23, 4  ;;  %s2117_s29 = int_to_ptr.vmem [resolvable:$true] %s2116_s29 }
 0x590   : > { %s2509_s24 = scalar_lea.vmem %s2117_s29, 256  ;;  %p2516_p11 = scmp.lt.s32.totalorder %s2117_s29, %s2117_s29 }
 0x591   : > { %p2510_p8 = scmp.ne.s32.totalorder %s2117_s29, %s2509_s24  ;;  %p2517_p12 = scmp.lt.s32.totalorder %s2509_s24, %s2509_s24 }
 0x593   : > { %p2511_p9 = pnand %p2510_p8, %p3477_p7  ;;  %p2518_p13 = por %p2517_p12, %p2516_p11 }
 0x595   : > { %p2512_p10 = pneg %p2511_p9 }
 0x597   : > { %p2519_p0 = pnand %p2518_p13, %p2512_p10 }
 0x599   : > { %2522 = shalt.err (!%p2519_p0)
}
 0x59a   : > { %s2523_s28 = scalar_lea.hbm %s3523_s11, 256 }
 0x59b   : > { %p2524_p1 = scmp.ne.s32.totalorder %s3523_s11, %s2523_s28  ;;  %p2529_p4 = scmp.lt.u32.totalorder %s2523_s28, %s3523_s11 }
 0x59d   : > { %p2525_p2 = pnand %p2524_p1, %p3477_p7 }
 0x59f   : > { %p2526_p3 = pneg %p2525_p2 }
 0x5a1   : > { %p2531_p5 = pnand %p2529_p4, %p2526_p3 }
 0x5a3   : > { %2534 = shalt.err (!%p2531_p5)
}
 0x5a4   : > { %s2573_s14 = smov 128   ;;  %s2574_s15 = smov 8  }
 0x5a5   : > { %2442 = dma.vmem_to_hbm [thread:$0]  (%p3477_p7), %s2117_s29, 256, %s3523_s11, [#allocation8], %s2573_s14, %s2573_s14, %s2574_s15  }
 0x5a6   : > { %2548 = dma.done.wait (%p3477_p7), [#allocation8], 256  }
 0x5a7   : > { %2550 = vsyncadd (%p3477_p7), [#allocation8], 4294967040 }
 0x5a8 PF: > { %s22_s19 = sadd.s32 1, %s2561_s19   ;;  %s3544_s17 = smov %s2557_s18 }
 0x5a9   : > { %p19_p6 = scmp.ge.s32.totalorder %s22_s19, 5   ;;  %s3545_s18 = smov %s3547_s21 }
 0x5ab   :  { %21 = sbr.rel (!%p19_p6) target bundleno = 2 (0x2), region = 122 }
 0x5b2   :  { %2132 = vsyncpa [#allocation8], 1 }
 0x5b3   :  { %2134 = vsyncpa [#allocation8 + $0x1], 1 }

</bundles_post_ra>
